<compile_context>
chip_gen: v6e
topology: v6e:2x2x1
jax: 0.10.0
libtpu: 0.0.40
codegen_flags: <defaults>
</compile_context>

<pallas_src>
import functools
import math

import jax
import jax.numpy as jnp
import numpy as np
from jax.experimental import pallas as pl
from jax.experimental.pallas import tpu as pltpu

LANE = 128


def _round_up(v, m):
    return ((v + m - 1) // m) * m


def _pad2d(arr, rows, cols, dtype=None):
    dtype = dtype or arr.dtype
    out = jnp.zeros((rows, cols), dtype)
    return out.at[: arr.shape[0], : arr.shape[1]].set(arr.astype(dtype))


# ------------------------------ fused kernel --------------------------------

def _fused_forward_kernel(num_convs, num_fc, conv_splits, *refs):
    """Entire GraphSAGE forward in one kernel; activations stay on-chip.

    refs = (a, x, [wcat_l, b_l] * num_convs, [w_j, b_j] * num_fc, out)

    Per SAGEConv layer:  relu( A @ (X @ Wl) + X @ Wr + b )
    where X @ [Wl | Wr] is one wide bf16 MXU matmul (f32 accumulation) and the
    neighbor term is reassociated to A @ (X @ Wl).
    """
    a = refs[0][...]                 # bf16 [Np, Np]
    h = refs[1][...]                 # bf16 [Np, Fp]
    idx = 2
    for l in range(num_convs):
        w_ref, b_ref = refs[idx], refs[idx + 1]
        idx += 2
        split = conv_splits[l]
        xw = jnp.dot(h, w_ref[...], preferred_element_type=jnp.float32)   # [Np, 2*out]
        agg = jnp.dot(a, xw[:, :split].astype(jnp.bfloat16),
                      preferred_element_type=jnp.float32)                 # A @ (X @ Wl)
        h32 = jnp.maximum(agg + xw[:, split:] + b_ref[...], 0.0)          # f32 epilogue
        # TODO(synk): dropout(p=0.5) is identity here (inference semantics).
        h = h32.astype(jnp.bfloat16)
    out = None
    for j in range(num_fc):
        w_ref, b_ref = refs[idx], refs[idx + 1]
        idx += 2
        out = jnp.dot(h, w_ref[...], preferred_element_type=jnp.float32) + b_ref[...]
        if j < num_fc - 1:
            h = jnp.maximum(out, 0.0).astype(jnp.bfloat16)
    o_ref = refs[idx]
    o_ref[...] = out.astype(o_ref.dtype)


_VMEM_SPEC = pl.BlockSpec(memory_space=pltpu.MemorySpace.VMEM)


def build_fused_forward(meta):
    """Returns a jitted fn (prep_params, x, a_pad) -> [n, embed_dim] f32."""
    n, n_pad = meta["n"], meta["n_pad"]
    f_pad, e_pad = meta["f_pad"], meta["e_pad"]
    embed_dim = meta["embed_dim"]
    conv_splits = meta["conv_splits"]

    def fwd(prep, x, a_pad):
        x_pad = _pad2d(x, n_pad, f_pad, jnp.bfloat16)
        operands = [a_pad, x_pad]
        for c in prep["convs"]:
            operands += [c["wcat"], c["b"]]
        for f in prep["fc"]:
            operands += [f["w"], f["b"]]
        out = pl.pallas_call(
            functools.partial(_fused_forward_kernel,
                              len(prep["convs"]), len(prep["fc"]), conv_splits),
            out_shape=jax.ShapeDtypeStruct((n_pad, e_pad), jnp.float32),
            in_specs=[_VMEM_SPEC] * len(operands),
            out_specs=_VMEM_SPEC,
            compiler_params=pltpu.CompilerParams(
                vmem_limit_bytes=32 * 1024 * 1024),
        )(*operands)
        return out[:n, :embed_dim]

    return jax.jit(fwd)


# ----------------------------- glue / params --------------------------------

def mean_aggr_matrix(edge_index, num_nodes):
    """Dense row-normalized adjacency: A[i, j] = 1/deg_in(i) per edge j -> i."""
    src, dst = edge_index[0], edge_index[1]
    adj = jnp.zeros((num_nodes, num_nodes), jnp.float32).at[dst, src].add(1.0)
    deg = adj.sum(axis=1, keepdims=True)
    return adj / jnp.maximum(deg, 1.0)


def make_meta(n, feat_dim, num_layers, hidden_dim, embed_dim):
    conv_dims = [(feat_dim, hidden_dim)]
    conv_dims += [(hidden_dim, hidden_dim)] * (num_layers - 2)
    if num_layers > 1:
        conv_dims += [(hidden_dim, embed_dim)]
    if num_layers > 1:
        fc_dims = [(embed_dim, hidden_dim), (hidden_dim, embed_dim)]
    else:
        fc_dims = [(hidden_dim, embed_dim)]
    conv_pads = [(_round_up(i, LANE), _round_up(o, LANE)) for i, o in conv_dims]
    fc_pads = [(_round_up(i, LANE), _round_up(o, LANE)) for i, o in fc_dims]
    return {
        "n": n,
        "n_pad": _round_up(n, LANE),
        "f_pad": conv_pads[0][0],
        "e_pad": fc_pads[-1][1],
        "embed_dim": embed_dim,
        "conv_dims": conv_dims,
        "fc_dims": fc_dims,
        "conv_pads": conv_pads,
        "fc_pads": fc_pads,
        "conv_splits": tuple(o for _, o in conv_pads),
    }


def xavier_uniform(key, fan_in, fan_out):
    bound = math.sqrt(6.0 / (fan_in + fan_out))
    # stored transposed relative to torch: shape (in, out)
    return jax.random.uniform(key, (fan_in, fan_out), jnp.float32, -bound, bound)


def init_raw_params(key, meta):
    convs, fc = [], []
    for d_in, d_out in meta["conv_dims"]:
        key, k1, k2, k3 = jax.random.split(key, 4)
        convs.append({
            "wl": xavier_uniform(k1, d_in, d_out),   # SAGEConv lin_l (neighbor)
            "wr": xavier_uniform(k2, d_in, d_out),   # SAGEConv lin_r (root)
            # small non-zero biases so the correctness check exercises the bias path
            "b": 0.1 * jax.random.normal(k3, (d_out,), jnp.float32),
        })
    for d_in, d_out in meta["fc_dims"]:
        key, k1, k2 = jax.random.split(key, 3)
        fc.append({
            "w": xavier_uniform(k1, d_in, d_out),
            "b": 0.1 * jax.random.normal(k2, (d_out,), jnp.float32),
        })
    return {"convs": convs, "fc": fc}


def prepare_params(raw, meta):
    """Pad to 128-lane multiples, concat Wl|Wr, cast matmul inputs to bf16."""
    convs = []
    for c, (din_p, dout_p) in zip(raw["convs"], meta["conv_pads"]):
        wl = _pad2d(c["wl"], din_p, dout_p, jnp.bfloat16)
        wr = _pad2d(c["wr"], din_p, dout_p, jnp.bfloat16)
        b = jnp.zeros((1, dout_p), jnp.float32).at[0, : c["b"].shape[0]].set(c["b"])
        convs.append({"wcat": jnp.concatenate([wl, wr], axis=1), "b": b})
    fcs = []
    for f, (din_p, dout_p) in zip(raw["fc"], meta["fc_pads"]):
        w = _pad2d(f["w"], din_p, dout_p, jnp.bfloat16)
        b = jnp.zeros((1, dout_p), jnp.float32).at[0, : f["b"].shape[0]].set(f["b"])
        fcs.append({"w": w, "b": b})
    return {"convs": convs, "fc": fcs}


def graphsage_reference(raw, x, a):
    """Pure-JAX f32 reference of the original (non-reassociated) formulation."""
    h = x
    for c in raw["convs"]:
        h = jax.nn.relu((a @ h) @ c["wl"] + h @ c["wr"] + c["b"])
    fcs = raw["fc"]
    for j, f in enumerate(fcs):
        h = h @ f["w"] + f["b"]
        if j < len(fcs) - 1:
            h = jax.nn.relu(h)
    return h


# --------------------------------- main --------------------------------------

if __name__ == "__main__":
    N, E = 64, 256
    FEAT_DIM, NUM_LAYERS, HIDDEN_DIM, EMBED_DIM = 16, 3, 32, 8

    key = jax.random.PRNGKey(0)
    kx, ke, kp = jax.random.split(key, 3)

    x = jax.random.normal(kx, (N, FEAT_DIM), jnp.float32)
    edge_index = jax.random.randint(ke, (2, E), 0, N, jnp.int32)

    meta = make_meta(N, FEAT_DIM, NUM_LAYERS, HIDDEN_DIM, EMBED_DIM)
    raw = init_raw_params(kp, meta)
    prep = prepare_params(raw, meta)

    # A depends only on the (static) graph: build + pad + cast ONCE, hoisted
    # out of the per-call forward path.
    a = mean_aggr_matrix(edge_index, N)
    a_pad = _pad2d(a, meta["n_pad"], meta["n_pad"], jnp.bfloat16)

    forward = build_fused_forward(meta)
    out = jax.block_until_ready(forward(prep, x, a_pad))
    assert out.shape == (N, EMBED_DIM)

    # Correctness vs pure-f32 reference (loose tolerance: kernel uses bf16
    # matmul inputs with f32 accumulation).
    ref = graphsage_reference(raw, x, a)
    np.testing.assert_allclose(np.asarray(out), np.asarray(ref), rtol=1e-1, atol=1e-1)

    print("KERNEL_OK")
</pallas_src>

<mosaic_0001>
module attributes {stable_mosaic.version = 11 : i64} {
  func.func @_fused_forward_kernel(%arg0: memref<128x128xbf16, #tpu.memory_space<vmem>>, %arg1: memref<128x128xbf16, #tpu.memory_space<vmem>>, %arg2: memref<128x256xbf16, #tpu.memory_space<vmem>>, %arg3: memref<1x128xf32, #tpu.memory_space<vmem>>, %arg4: memref<128x256xbf16, #tpu.memory_space<vmem>>, %arg5: memref<1x128xf32, #tpu.memory_space<vmem>>, %arg6: memref<128x256xbf16, #tpu.memory_space<vmem>>, %arg7: memref<1x128xf32, #tpu.memory_space<vmem>>, %arg8: memref<128x128xbf16, #tpu.memory_space<vmem>>, %arg9: memref<1x128xf32, #tpu.memory_space<vmem>>, %arg10: memref<128x128xbf16, #tpu.memory_space<vmem>>, %arg11: memref<1x128xf32, #tpu.memory_space<vmem>>, %arg12: memref<128x128xf32, #tpu.memory_space<vmem>>) attributes {dimension_semantics = [], scalar_prefetch = 0 : i64, scratch_operands = 0 : i64, tpu.core_type = #tpu.core_type<tc>} {
    %c0 = arith.constant 0 : index
    %c0_0 = arith.constant 0 : index
    %0 = vector.load %arg0[%c0, %c0_0] : memref<128x128xbf16, #tpu.memory_space<vmem>>, vector<128x128xbf16>
    %c0_1 = arith.constant 0 : index
    %c0_2 = arith.constant 0 : index
    %1 = vector.load %arg1[%c0_1, %c0_2] : memref<128x128xbf16, #tpu.memory_space<vmem>>, vector<128x128xbf16>
    %c0_3 = arith.constant 0 : index
    %c0_4 = arith.constant 0 : index
    %2 = vector.load %arg2[%c0_3, %c0_4] : memref<128x256xbf16, #tpu.memory_space<vmem>>, vector<128x256xbf16>
    %cst = arith.constant dense<0.000000e+00> : vector<128x256xf32>
    %3 = tpu.matmul %1, %2, %cst {dimension_numbers = #tpu.dot_dimension_numbers<[1], [0], [0], [1], [0, 0, 1, 1], [], []>} : vector<128x128xbf16>, vector<128x256xbf16>, vector<128x256xf32> -> vector<128x256xf32>
    %4 = vector.extract_strided_slice %3 {offsets = [0, 0], sizes = [128, 128], strides = [1, 1]} : vector<128x256xf32> to vector<128x128xf32>
    %5 = arith.truncf %4 : vector<128x128xf32> to vector<128x128xbf16>
    %cst_5 = arith.constant dense<0.000000e+00> : vector<128x128xf32>
    %6 = tpu.matmul %0, %5, %cst_5 {dimension_numbers = #tpu.dot_dimension_numbers<[1], [0], [0], [1], [0, 0, 1, 1], [], []>} : vector<128x128xbf16>, vector<128x128xbf16>, vector<128x128xf32> -> vector<128x128xf32>
    %7 = vector.extract_strided_slice %3 {offsets = [0, 128], sizes = [128, 128], strides = [1, 1]} : vector<128x256xf32> to vector<128x128xf32>
    %8 = arith.addf %6, %7 : vector<128x128xf32>
    %c0_6 = arith.constant 0 : index
    %c0_7 = arith.constant 0 : index
    %9 = vector.load %arg3[%c0_6, %c0_7] : memref<1x128xf32, #tpu.memory_space<vmem>>, vector<1x128xf32>
    %10 = vector.broadcast %9 : vector<1x128xf32> to vector<128x128xf32>
    %11 = arith.addf %8, %10 : vector<128x128xf32>
    %cst_8 = arith.constant 0.000000e+00 : f32
    %12 = vector.broadcast %cst_8 : f32 to vector<128x128xf32>
    %13 = arith.maximumf %11, %12 : vector<128x128xf32>
    %14 = arith.truncf %13 : vector<128x128xf32> to vector<128x128xbf16>
    %c0_9 = arith.constant 0 : index
    %c0_10 = arith.constant 0 : index
    %15 = vector.load %arg4[%c0_9, %c0_10] : memref<128x256xbf16, #tpu.memory_space<vmem>>, vector<128x256xbf16>
    %cst_11 = arith.constant dense<0.000000e+00> : vector<128x256xf32>
    %16 = tpu.matmul %14, %15, %cst_11 {dimension_numbers = #tpu.dot_dimension_numbers<[1], [0], [0], [1], [0, 0, 1, 1], [], []>} : vector<128x128xbf16>, vector<128x256xbf16>, vector<128x256xf32> -> vector<128x256xf32>
    %17 = vector.extract_strided_slice %16 {offsets = [0, 0], sizes = [128, 128], strides = [1, 1]} : vector<128x256xf32> to vector<128x128xf32>
    %18 = arith.truncf %17 : vector<128x128xf32> to vector<128x128xbf16>
    %cst_12 = arith.constant dense<0.000000e+00> : vector<128x128xf32>
    %19 = tpu.matmul %0, %18, %cst_12 {dimension_numbers = #tpu.dot_dimension_numbers<[1], [0], [0], [1], [0, 0, 1, 1], [], []>} : vector<128x128xbf16>, vector<128x128xbf16>, vector<128x128xf32> -> vector<128x128xf32>
    %20 = vector.extract_strided_slice %16 {offsets = [0, 128], sizes = [128, 128], strides = [1, 1]} : vector<128x256xf32> to vector<128x128xf32>
    %21 = arith.addf %19, %20 : vector<128x128xf32>
    %c0_13 = arith.constant 0 : index
    %c0_14 = arith.constant 0 : index
    %22 = vector.load %arg5[%c0_13, %c0_14] : memref<1x128xf32, #tpu.memory_space<vmem>>, vector<1x128xf32>
    %23 = vector.broadcast %22 : vector<1x128xf32> to vector<128x128xf32>
    %24 = arith.addf %21, %23 : vector<128x128xf32>
    %cst_15 = arith.constant 0.000000e+00 : f32
    %25 = vector.broadcast %cst_15 : f32 to vector<128x128xf32>
    %26 = arith.maximumf %24, %25 : vector<128x128xf32>
    %27 = arith.truncf %26 : vector<128x128xf32> to vector<128x128xbf16>
    %c0_16 = arith.constant 0 : index
    %c0_17 = arith.constant 0 : index
    %28 = vector.load %arg6[%c0_16, %c0_17] : memref<128x256xbf16, #tpu.memory_space<vmem>>, vector<128x256xbf16>
    %cst_18 = arith.constant dense<0.000000e+00> : vector<128x256xf32>
    %29 = tpu.matmul %27, %28, %cst_18 {dimension_numbers = #tpu.dot_dimension_numbers<[1], [0], [0], [1], [0, 0, 1, 1], [], []>} : vector<128x128xbf16>, vector<128x256xbf16>, vector<128x256xf32> -> vector<128x256xf32>
    %30 = vector.extract_strided_slice %29 {offsets = [0, 0], sizes = [128, 128], strides = [1, 1]} : vector<128x256xf32> to vector<128x128xf32>
    %31 = arith.truncf %30 : vector<128x128xf32> to vector<128x128xbf16>
    %cst_19 = arith.constant dense<0.000000e+00> : vector<128x128xf32>
    %32 = tpu.matmul %0, %31, %cst_19 {dimension_numbers = #tpu.dot_dimension_numbers<[1], [0], [0], [1], [0, 0, 1, 1], [], []>} : vector<128x128xbf16>, vector<128x128xbf16>, vector<128x128xf32> -> vector<128x128xf32>
    %33 = vector.extract_strided_slice %29 {offsets = [0, 128], sizes = [128, 128], strides = [1, 1]} : vector<128x256xf32> to vector<128x128xf32>
    %34 = arith.addf %32, %33 : vector<128x128xf32>
    %c0_20 = arith.constant 0 : index
    %c0_21 = arith.constant 0 : index
    %35 = vector.load %arg7[%c0_20, %c0_21] : memref<1x128xf32, #tpu.memory_space<vmem>>, vector<1x128xf32>
    %36 = vector.broadcast %35 : vector<1x128xf32> to vector<128x128xf32>
    %37 = arith.addf %34, %36 : vector<128x128xf32>
    %cst_22 = arith.constant 0.000000e+00 : f32
    %38 = vector.broadcast %cst_22 : f32 to vector<128x128xf32>
    %39 = arith.maximumf %37, %38 : vector<128x128xf32>
    %40 = arith.truncf %39 : vector<128x128xf32> to vector<128x128xbf16>
    %c0_23 = arith.constant 0 : index
    %c0_24 = arith.constant 0 : index
    %41 = vector.load %arg8[%c0_23, %c0_24] : memref<128x128xbf16, #tpu.memory_space<vmem>>, vector<128x128xbf16>
    %cst_25 = arith.constant dense<0.000000e+00> : vector<128x128xf32>
    %42 = tpu.matmul %40, %41, %cst_25 {dimension_numbers = #tpu.dot_dimension_numbers<[1], [0], [0], [1], [0, 0, 1, 1], [], []>} : vector<128x128xbf16>, vector<128x128xbf16>, vector<128x128xf32> -> vector<128x128xf32>
    %c0_26 = arith.constant 0 : index
    %c0_27 = arith.constant 0 : index
    %43 = vector.load %arg9[%c0_26, %c0_27] : memref<1x128xf32, #tpu.memory_space<vmem>>, vector<1x128xf32>
    %44 = vector.broadcast %43 : vector<1x128xf32> to vector<128x128xf32>
    %45 = arith.addf %42, %44 : vector<128x128xf32>
    %cst_28 = arith.constant 0.000000e+00 : f32
    %46 = vector.broadcast %cst_28 : f32 to vector<128x128xf32>
    %47 = arith.maximumf %45, %46 : vector<128x128xf32>
    %48 = arith.truncf %47 : vector<128x128xf32> to vector<128x128xbf16>
    %c0_29 = arith.constant 0 : index
    %c0_30 = arith.constant 0 : index
    %49 = vector.load %arg10[%c0_29, %c0_30] : memref<128x128xbf16, #tpu.memory_space<vmem>>, vector<128x128xbf16>
    %cst_31 = arith.constant dense<0.000000e+00> : vector<128x128xf32>
    %50 = tpu.matmul %48, %49, %cst_31 {dimension_numbers = #tpu.dot_dimension_numbers<[1], [0], [0], [1], [0, 0, 1, 1], [], []>} : vector<128x128xbf16>, vector<128x128xbf16>, vector<128x128xf32> -> vector<128x128xf32>
    %c0_32 = arith.constant 0 : index
    %c0_33 = arith.constant 0 : index
    %51 = vector.load %arg11[%c0_32, %c0_33] : memref<1x128xf32, #tpu.memory_space<vmem>>, vector<1x128xf32>
    %52 = vector.broadcast %51 : vector<1x128xf32> to vector<128x128xf32>
    %53 = arith.addf %50, %52 : vector<128x128xf32>
    %c0_34 = arith.constant 0 : index
    %c0_35 = arith.constant 0 : index
    %54 = vector.load %arg12[%c0_34, %c0_35] : memref<128x128xf32, #tpu.memory_space<vmem>>, vector<128x128xf32>
    tpu.vector_store %arg12[%c0_34, %c0_35], %53 {strides = array<i32>} : memref<128x128xf32, #tpu.memory_space<vmem>>, vector<128x128xf32>,
    return
  }
}

</mosaic_0001>

<bundles_post_ra>
// kernel: fwd.1
= control target key start
LH: loop header
LB: loop body
LE: loop exit
PB: predicated region body
PF: predicated region fallthrough
CT: control target
= control target key end

     0   :  { %17 = vsyncpa [#allocation3], 0  ;;  %s2776_s0 = inlined_call_operand.hbm [shape: bf16[128,128], index: 0, kind: input, shape index: {}]   ;;  %s2777_s1 = inlined_call_operand.vmem [shape: bf16[128,128], index: 1, kind: input, shape index: {}]   ;;  %s2778_s2 = inlined_call_operand.vmem [shape: bf16[128,256], index: 2, kind: input, shape index: {}]   ;;  %s2779_s3 = inlined_call_operand.vmem [shape: f32[1,128], index: 3, kind: input, shape index: {}]   ;;  %s2780_s4 = inlined_call_operand.hbm [shape: bf16[128,256], index: 4, kind: input, shape index: {}]   ;;  %s2781_s5 = inlined_call_operand.vmem [shape: f32[1,128], index: 5, kind: input, shape index: {}]   ;;  %s2782_s6 = inlined_call_operand.hbm [shape: bf16[128,256], index: 6, kind: input, shape index: {}]   ;;  %s2783_s7 = inlined_call_operand.vmem [shape: f32[1,128], index: 7, kind: input, shape index: {}]   ;;  %s2784_s8 = inlined_call_operand.hbm [shape: bf16[128,128], index: 8, kind: input, shape index: {}]   ;;  %s2785_s9 = inlined_call_operand.vmem [shape: f32[1,128], index: 9, kind: input, shape index: {}]   ;;  %s2786_s10 = inlined_call_operand.hbm [shape: bf16[128,128], index: 10, kind: input, shape index: {}]   ;;  %s2787_s11 = inlined_call_operand.vmem [shape: f32[1,128], index: 11, kind: input, shape index: {}]   ;;  %s2788_s12 = inlined_call_operand.vmem [shape: f32[128,128], index: 12, kind: output, shape index: {}]  }
   0x1   :  { %18 = vsyncpa [#allocation5], 0 }
   0x2   :  { %19 = vsyncpa [#allocation8], 0  ;;  %s2265_s21 = smov [#allocation4]  }
   0x3   :  { %s43_s22 = sshll.u32 %s2265_s21, 4  ;;  %s44_s22 = int_to_ptr.vmem [resolvable:$true] %s43_s22 }
   0x4   :  { %s2167_s23 = scalar_lea.vmem %s44_s22, 2048  ;;  %p2172_p1 = scmp.lt.s32.totalorder %s44_s22, %s44_s22 }
   0x5   :  { %p2168_p0 = scmp.ne.s32.totalorder %s44_s22, %s2167_s23  ;;  %p2173_p2 = scmp.lt.s32.totalorder %s2167_s23, %s2167_s23 }
   0x7   :  { %p2174_p3 = por %p2173_p2, %p2172_p1 }
   0x9   :  { %p2175_p4 = pnand %p2174_p3, %p2168_p0 }
   0xb   :  { %2178 = shalt.err (!%p2175_p4)
}
   0xc   :  { %s2266_s24 = smov 128   ;;  %s2267_s25 = smov 8  }
   0xd   :  { %49 = dma.hbm_to_vmem [thread:$0]  %s2780_s4, 2048, %s44_s22, [#allocation5], %s2266_s24, %s2266_s24, %s2267_s25  }
   0xe   :  { %s2268_s28 = smov [#allocation7]   ;;  %s2269_s30 = smov [#allocation2]  }
   0xf   :  { %s71_s29 = sshll.u32 %s2268_s28, 4  ;;  %s25_s13 = sshll.u32 %s2269_s30, 4  ;;  %s72_s29 = int_to_ptr.vmem [resolvable:$true] %s71_s29  ;;  %s26_s13 = int_to_ptr.vmem [resolvable:$true] %s25_s13 }
  0x10   :  { %s2187_s14 = scalar_lea.vmem %s72_s29, 1024  ;;  %p2192_p6 = scmp.lt.s32.totalorder %s72_s29, %s72_s29 }
  0x11   :  { %p2188_p5 = scmp.ne.s32.totalorder %s72_s29, %s2187_s14  ;;  %p2193_p7 = scmp.lt.s32.totalorder %s2187_s14, %s2187_s14 }
  0x13   :  { %p2194_p8 = por %p2193_p7, %p2192_p6 }
  0x15   :  { %p2195_p9 = pnand %p2194_p8, %p2188_p5 }
  0x17   :  { %2198 = shalt.err (!%p2195_p9)
}
  0x18   :  { %s2270_s15 = smov 64   ;;  %s2271_s16 = smov 4  }
  0x19   :  { %77 = dma.hbm_to_vmem [thread:$0]  %s2784_s8, 1024, %s72_s29, [#allocation8], %s2270_s15, %s2270_s15, %s2271_s16  }
  0x1a   :  { %s2207_s4 = scalar_lea.vmem %s26_s13, 1024  ;;  %p2212_p11 = scmp.lt.s32.totalorder %s26_s13, %s26_s13 }
  0x1b   :  { %p2208_p10 = scmp.ne.s32.totalorder %s26_s13, %s2207_s4  ;;  %p2213_p12 = scmp.lt.s32.totalorder %s2207_s4, %s2207_s4 }
  0x1d   :  { %p2214_p13 = por %p2213_p12, %p2212_p11 }
  0x1f   :  { %p2215_p0 = pnand %p2214_p13, %p2208_p10 }
  0x21   :  { %2218 = shalt.err (!%p2215_p0)
}
  0x22   :  { %31 = dma.hbm_to_vmem [thread:$0]  %s2776_s0, 1024, %s26_s13, [#allocation3], %s2270_s15, %s2270_s15, %s2271_s16  }
  0x23   :  { %s2272_s21 = smov [#allocation6]   ;;  %s2273_s23 = smov [#allocation9]  }
  0x24   :  { %s57_s22 = sshll.u32 %s2272_s21, 4  ;;  %s85_s8 = sshll.u32 %s2273_s23, 4  ;;  %s58_s22 = int_to_ptr.vmem [resolvable:$true] %s57_s22  ;;  %s86_s8 = int_to_ptr.vmem [resolvable:$true] %s85_s8 }
  0x25   :  { %s2227_s26 = scalar_lea.vmem %s58_s22, 2048  ;;  %p2232_p2 = scmp.lt.s32.totalorder %s58_s22, %s58_s22 }
  0x26   :  { %p2228_p1 = scmp.ne.s32.totalorder %s58_s22, %s2227_s26  ;;  %p2233_p3 = scmp.lt.s32.totalorder %s2227_s26, %s2227_s26 }
  0x28   :  { %p2234_p4 = por %p2233_p3, %p2232_p2 }
  0x2a   :  { %p2235_p5 = pnand %p2234_p4, %p2228_p1 }
  0x2c   :  { %2238 = shalt.err (!%p2235_p5)
}
  0x2d   :  { %63 = dma.hbm_to_vmem [thread:$0]  %s2782_s6, 2048, %s58_s22, [#allocation5], %s2266_s24, %s2266_s24, %s2267_s25  }
  0x2e   :  { %s2247_s0 = scalar_lea.vmem %s86_s8, 1024  ;;  %p2252_p7 = scmp.lt.s32.totalorder %s86_s8, %s86_s8 }
  0x2f   :  { %p2248_p6 = scmp.ne.s32.totalorder %s86_s8, %s2247_s0  ;;  %p2253_p8 = scmp.lt.s32.totalorder %s2247_s0, %s2247_s0 }
  0x31   :  { %p2254_p9 = por %p2253_p8, %p2252_p7 }
  0x33   :  { %p2255_p10 = pnand %p2254_p9, %p2248_p6 }
  0x35   :  { %2258 = shalt.err (!%p2255_p10)
}
  0x36   :  { %91 = dma.hbm_to_vmem [thread:$0]  %s2786_s10, 1024, %s86_s8, [#allocation8], %s2270_s15, %s2270_s15, %s2271_s16  }
  0x37   :  { %2259 = dma.done.wait [#allocation3], 1024  }
  0x38   :  { %2260 = vsyncadd [#allocation3], 4294966272 }
  0x39   :  { %2261 = dma.done.wait [#allocation5], 4096  }
  0x3a   :  { %2262 = vsyncadd [#allocation5], 4294963200 }
  0x3b   :  { %2263 = dma.done.wait [#allocation8], 2048  }
  0x3c   :  { %2264 = vsyncadd [#allocation8], 4294965248  ;;  %v2274_v0 = vmov 0   ;;  %v2055_v1 = vld [vmem:[%s2778_s2 + $0x74] ss:$8 sps:$4 sm:$0xff]   ;;  %v2079_v17 = vld [vmem:[%s2777_s1] sm:$0xff]  }
  0x3d   :  { %318 = vmatprep.mubr.bf16.mxu0 %v2274_v0  ;;  %v2057_v2 = vld [vmem:[%s2778_s2 + $0x70] ss:$8 sps:$4 sm:$0xff]   ;;  %286 = vmatprep.subr.bf16.mxu0 %v2055_v1  ;;  %v2058_v3 = vld [vmem:[%s2778_s2 + $0x64] ss:$8 sps:$4 sm:$0xff]   ;;  %v2060_v4 = vld [vmem:[%s2778_s2 + $0x60] ss:$8 sps:$4 sm:$0xff]  }
  0x3e   :  { %287 = vmatpush1.bf16.msra.mxu0 %v2057_v2  ;;  %v2061_v5 = vld [vmem:[%s2778_s2 + $0x54] ss:$8 sps:$4 sm:$0xff]   ;;  %v2063_v6 = vld [vmem:[%s2778_s2 + $0x50] ss:$8 sps:$4 sm:$0xff]   ;;  %v2064_v7 = vld [vmem:[%s2778_s2 + $0x44] ss:$8 sps:$4 sm:$0xff]  }
  0x3f   :  { %288 = vmatprep.subr.bf16.mxu0 %v2058_v3  ;;  %v2066_v8 = vld [vmem:[%s2778_s2 + $0x40] ss:$8 sps:$4 sm:$0xff]   ;;  %v2067_v9 = vld [vmem:[%s2778_s2 + $0x34] ss:$8 sps:$4 sm:$0xff]   ;;  %v2069_v10 = vld [vmem:[%s2778_s2 + $0x30] ss:$8 sps:$4 sm:$0xff]  }
  0x40   :  { %v2070_v11 = vld [vmem:[%s2778_s2 + $0x24] ss:$8 sps:$4 sm:$0xff]   ;;  %v2072_v12 = vld [vmem:[%s2778_s2 + $0x20] ss:$8 sps:$4 sm:$0xff]   ;;  %v2073_v13 = vld [vmem:[%s2778_s2 + $0x14] ss:$8 sps:$4 sm:$0xff]  }
  0x41   :  { %v2075_v14 = vld [vmem:[%s2778_s2 + $0x10] ss:$8 sps:$4 sm:$0xff]   ;;  %v2076_v15 = vld [vmem:[%s2778_s2 + $0x4] ss:$8 sps:$4 sm:$0xff]   ;;  %v2078_v16 = vld [vmem:[%s2778_s2] ss:$8 sps:$4 sm:$0xff]  }
  0x42   :  { %289 = vmatpush1.bf16.msra.mxu0 %v2060_v4  ;;  %v2080_v18 = vld [vmem:[%s2777_s1 + $0x8] sm:$0xff]   ;;  %v2081_v19 = vld [vmem:[%s2777_s1 + $0x10] sm:$0xff]   ;;  %v2082_v20 = vld [vmem:[%s2777_s1 + $0x18] sm:$0xff]  }
  0x43   :  { %290 = vmatprep.subr.bf16.mxu0 %v2061_v5  ;;  %v2083_v21 = vld [vmem:[%s2777_s1 + $0x20] sm:$0xff]   ;;  %v2084_v22 = vld [vmem:[%s2777_s1 + $0x28] sm:$0xff]   ;;  %v2085_v23 = vld [vmem:[%s2777_s1 + $0x30] sm:$0xff]  }
  0x44   :  { %v2086_v24 = vld [vmem:[%s2777_s1 + $0x38] sm:$0xff]   ;;  %v2450_v25 = vld [vmem:[#allocation2] sm:$0xff]   ;;  %v2484_v3 = vld [vmem:[#allocation2 + $0x8] sm:$0xff]  }
  0x45   :  { %1885 = vmatprep.mubr.bf16.mxu1 %v2450_v25  ;;  %v2097_v2 = vld [vmem:[#allocation4 + $0x74] ss:$8 sps:$4 sm:$0xff]   ;;  %v2095_v5 = vld [vmem:[#allocation4 + $0x70] ss:$8 sps:$4 sm:$0xff]  }
  0x46   :  { %291 = vmatpush1.bf16.msra.mxu0 %v2063_v6  ;;  %v2486_v4 = vld [vmem:[#allocation2 + $0x10] sm:$0xff]   ;;  %v2100_v6 = vld [vmem:[#allocation4 + $0x64] ss:$8 sps:$4 sm:$0xff]  }
  0x47   :  { %292 = vmatprep.subr.bf16.mxu0 %v2064_v7  ;;  %v2098_v7 = vld [vmem:[#allocation4 + $0x60] ss:$8 sps:$4 sm:$0xff]  }
  0x4a   :  { %293 = vmatpush1.bf16.msra.mxu0 %v2066_v8  ;;  %v2103_v8 = vld [vmem:[#allocation4 + $0x54] ss:$8 sps:$4 sm:$0xff]  }
  0x4b   :  { %294 = vmatprep.subr.bf16.mxu0 %v2067_v9  ;;  %v2490_v9 = vld [vmem:[#allocation2 + $0x18] sm:$0xff]  }
  0x4e   :  { %295 = vmatpush1.bf16.msra.mxu0 %v2069_v10  ;;  %v2492_v10 = vld [vmem:[#allocation2 + $0x20] sm:$0xff]  }
  0x4f   :  { %296 = vmatprep.subr.bf16.mxu0 %v2070_v11  ;;  %v2101_v11 = vld [vmem:[#allocation4 + $0x50] ss:$8 sps:$4 sm:$0xff]  }
  0x52   :  { %297 = vmatpush1.bf16.msra.mxu0 %v2072_v12  ;;  %v2106_v12 = vld [vmem:[#allocation4 + $0x44] ss:$8 sps:$4 sm:$0xff]  }
  0x53   :  { %298 = vmatprep.subr.bf16.mxu0 %v2073_v13  ;;  %v2104_v13 = vld [vmem:[#allocation4 + $0x40] ss:$8 sps:$4 sm:$0xff]  }
  0x56   :  { %299 = vmatpush1.bf16.msra.mxu0 %v2075_v14  ;;  %v2109_v14 = vld [vmem:[#allocation4 + $0x34] ss:$8 sps:$4 sm:$0xff]  }
  0x57   :  { %300 = vmatprep.subr.bf16.mxu0 %v2076_v15  ;;  %v2496_v15 = vld [vmem:[#allocation2 + $0x28] sm:$0xff]  }
  0x5a   :  { %301 = vmatpush1.bf16.msra.mxu0 %v2078_v16  ;;  %v2498_v16 = vld [vmem:[#allocation2 + $0x30] sm:$0xff]  }
  0x5d   :  { %319 = vmatmul.mubr.bf16.vlgmr.msra.gmra.mxu0 %v2079_v17  ;;  %v2107_v17 = vld [vmem:[#allocation4 + $0x30] ss:$8 sps:$4 sm:$0xff]  }
  0x5e   :  { %328 = vmatprep.mubr.bf16.mxu0 %v2274_v0 }
  0x65   :  { %329 = vmatmul.mubr.bf16.gmra.mxu0 %v2080_v18  ;;  %v2502_v18 = vld [vmem:[#allocation2 + $0x38] sm:$0xff]  }
  0x66   :  { %338 = vmatprep.mubr.bf16.mxu0 %v2274_v0 }
  0x6d   :  { %339 = vmatmul.mubr.bf16.gmra.mxu0 %v2081_v19  ;;  %v2112_v19 = vld [vmem:[#allocation4 + $0x24] ss:$8 sps:$4 sm:$0xff]  }
  0x6e   :  { %348 = vmatprep.mubr.bf16.mxu0 %v2274_v0 }
  0x75   :  { %349 = vmatmul.mubr.bf16.gmra.mxu0 %v2082_v20  ;;  %v2110_v20 = vld [vmem:[#allocation4 + $0x20] ss:$8 sps:$4 sm:$0xff]  }
  0x76   :  { %358 = vmatprep.mubr.bf16.mxu0 %v2274_v0 }
  0x7d   :  { %359 = vmatmul.mubr.bf16.gmra.mxu0 %v2083_v21  ;;  %v2115_v21 = vld [vmem:[#allocation4 + $0x14] ss:$8 sps:$4 sm:$0xff]  }
  0x7e   :  { %368 = vmatprep.mubr.bf16.mxu0 %v2274_v0 }
  0x85   :  { %369 = vmatmul.mubr.bf16.gmra.mxu0 %v2084_v22  ;;  %v2113_v22 = vld [vmem:[#allocation4 + $0x10] ss:$8 sps:$4 sm:$0xff]  }
  0x86   :  { %378 = vmatprep.mubr.bf16.mxu0 %v2274_v0 }
  0x8d   :  { %379 = vmatmul.mubr.bf16.gmra.mxu0 %v2085_v23  ;;  %v2118_v23 = vld [vmem:[#allocation4 + $0x4] ss:$8 sps:$4 sm:$0xff]  }
  0x8e   :  { %388 = vmatprep.mubr.bf16.mxu0 %v2274_v0 }
  0x95   :  { %389 = vmatmul.mubr.bf16.gmra.mxu0 %v2086_v24  ;;  %v2116_v24 = vld [vmem:[#allocation4] ss:$8 sps:$4 sm:$0xff]  }
  0x96   :  { %1917 = vmatprep.mubr.bf16.mxu0 %v2450_v25 }
 0x11d   :  { %v320_v26 = vpop.f32.mrf.mxu0 }
 0x11f   :  { %v2454_v27 = vpop.f32.mrf.mxu0 }
 0x121   :  { %v324_v28 = vpop.f32.mrf.mxu0 }
 0x122   :  { %v399_v29 = vpack.c.bf16 %v324_v28, %v320_v26 }
 0x123   :  { %v2456_v30 = vpop.f32.mrf.mxu0 }
 0x125   :  { %v330_v31 = vpop.f32.mrf.mxu0 }
 0x127   :  { %v2458_v32 = vpop.f32.mrf.mxu0 }
 0x129   :  { %v334_v33 = vpop.f32.mrf.mxu0 }
 0x12a   :  { %v400_v34 = vpack.c.bf16 %v334_v33, %v330_v31  ;;  %v2510_v33 = vld [vmem:[%s2779_s3] ss:$0 sm:$0xff] }
 0x12b   :  { %v2460_v35 = vpop.f32.mrf.mxu0 }
 0x12d   :  { %v340_v36 = vpop.f32.mrf.mxu0 }
 0x12f   :  { %v2462_v37 = vpop.f32.mrf.mxu0 }
 0x131   :  { %v344_v38 = vpop.f32.mrf.mxu0 }
 0x132   :  { %v401_v1 = vpack.c.bf16 %v344_v38, %v340_v36 }
 0x133   :  { %v2464_v39 = vpop.f32.mrf.mxu0 }
 0x135   :  { %v350_v40 = vpop.f32.mrf.mxu0 }
 0x137   :  { %v2466_v41 = vpop.f32.mrf.mxu0 }
 0x139   :  { %v354_v42 = vpop.f32.mrf.mxu0 }
 0x13a   :  { %v402_v63 = vpack.c.bf16 %v354_v42, %v350_v40 }
 0x13b   :  { %v2468_v43 = vpop.f32.mrf.mxu0 }
 0x13d   :  { %v360_v44 = vpop.f32.mrf.mxu0 }
 0x13f   :  { %v2470_v45 = vpop.f32.mrf.mxu0 }
 0x141   :  { %v364_v46 = vpop.f32.mrf.mxu0 }
 0x142   :  { %v403_v62 = vpack.c.bf16 %v364_v46, %v360_v44 }
 0x143   :  { %v2472_v47 = vpop.f32.mrf.mxu0 }
 0x145   :  { %v370_v48 = vpop.f32.mrf.mxu0 }
 0x147   :  { %v2474_v49 = vpop.f32.mrf.mxu0 }
 0x149   :  { %v374_v50 = vpop.f32.mrf.mxu0 }
 0x14a   :  { %v404_v61 = vpack.c.bf16 %v374_v50, %v370_v48 }
 0x14b   :  { %v2476_v51 = vpop.f32.mrf.mxu0 }
 0x14d   :  { %v380_v52 = vpop.f32.mrf.mxu0 }
 0x14f   :  { %v2478_v53 = vpop.f32.mrf.mxu0 }
 0x151   :  { %v384_v54 = vpop.f32.mrf.mxu0 }
 0x152   :  { %v405_v60 = vpack.c.bf16 %v384_v54, %v380_v52 }
 0x153   :  { %v2480_v55 = vpop.f32.mrf.mxu0 }
 0x155   :  { %v390_v56 = vpop.f32.mrf.mxu0 }
 0x157   :  { %v2482_v57 = vpop.f32.mrf.mxu0 }
 0x159   :  { %v394_v58 = vpop.f32.mrf.mxu0 }
 0x15a   :  { %v406_v59 = vpack.c.bf16 %v394_v58, %v390_v56 }
 0x15c   :  { %1869 = vmatprep.subr.bf16.mxu1 %v406_v59 }
 0x15d   :  { %1870 = vmatpush3.bf16.msra.mxu1 %v406_v59 }
 0x15e   :  { %1871 = vmatprep.subr.bf16.mxu1 %v405_v60 }
 0x161   :  { %1872 = vmatpush3.bf16.msra.mxu1 %v405_v60 }
 0x162   :  { %1873 = vmatprep.subr.bf16.mxu1 %v404_v61 }
 0x165   :  { %1874 = vmatpush3.bf16.msra.mxu1 %v404_v61 }
 0x166   :  { %1875 = vmatprep.subr.bf16.mxu1 %v403_v62 }
 0x169   :  { %1876 = vmatpush3.bf16.msra.mxu1 %v403_v62 }
 0x16a   :  { %1877 = vmatprep.subr.bf16.mxu1 %v402_v63 }
 0x16d   :  { %1878 = vmatpush3.bf16.msra.mxu1 %v402_v63 }
 0x16e   :  { %1879 = vmatprep.subr.bf16.mxu1 %v401_v1 }
 0x171   :  { %1880 = vmatpush3.bf16.msra.mxu1 %v401_v1 }
 0x172   :  { %1881 = vmatprep.subr.bf16.mxu1 %v400_v34 }
 0x175   :  { %1882 = vmatpush3.bf16.msra.mxu1 %v400_v34 }
 0x176   :  { %1883 = vmatprep.subr.bf16.mxu1 %v399_v29 }
 0x179   :  { %1884 = vmatpush3.bf16.msra.mxu1 %v399_v29 }
 0x17a   :  { %695 = vmatprep.subr.bf16.mxu1 %v2097_v2 }
 0x17c   :  { %1886 = vmatmul.mubr.bf16.vlgmr.msra.gmra.mxu1 %v2484_v3 }
 0x17d   :  { %1889 = vmatprep.mubr.bf16.mxu1 %v2486_v4  ;;  %696 = vmatpush1.bf16.msra.mxu1 %v2095_v5 }
 0x17e   :  { %697 = vmatprep.subr.bf16.mxu1 %v2100_v6 }
 0x181   :  { %698 = vmatpush1.bf16.msra.mxu1 %v2098_v7 }
 0x182   :  { %699 = vmatprep.subr.bf16.mxu1 %v2103_v8 }
 0x184   :  { %1890 = vmatmul.mubr.bf16.gmra.mxu1 %v2490_v9 }
 0x185   :  { %1893 = vmatprep.mubr.bf16.mxu1 %v2492_v10  ;;  %700 = vmatpush1.bf16.msra.mxu1 %v2101_v11 }
 0x186   :  { %701 = vmatprep.subr.bf16.mxu1 %v2106_v12 }
 0x189   :  { %702 = vmatpush1.bf16.msra.mxu1 %v2104_v13 }
 0x18a   :  { %703 = vmatprep.subr.bf16.mxu1 %v2109_v14 }
 0x18c   :  { %1894 = vmatmul.mubr.bf16.gmra.mxu1 %v2496_v15 }
 0x18d   :  { %1897 = vmatprep.mubr.bf16.mxu1 %v2498_v16  ;;  %704 = vmatpush1.bf16.msra.mxu1 %v2107_v17 }
 0x18e   :  { %705 = vmatprep.subr.bf16.mxu1 %v2112_v19 }
 0x191   :  { %706 = vmatpush1.bf16.msra.mxu1 %v2110_v20 }
 0x192   :  { %707 = vmatprep.subr.bf16.mxu1 %v2115_v21 }
 0x194   :  { %1898 = vmatmul.mubr.bf16.gmra.mxu1 %v2502_v18 }
 0x195   :  { %727 = vmatprep.mubr.bf16.mxu1 %v2274_v0  ;;  %708 = vmatpush1.bf16.msra.mxu1 %v2113_v22 }
 0x196   :  { %709 = vmatprep.subr.bf16.mxu1 %v2118_v23 }
 0x199   :  { %710 = vmatpush1.bf16.msra.mxu1 %v2116_v24 }
 0x23c   :  { %v1887_v26 = vpop.f32.mrf.mxu1 }
 0x23d   :  { %v498_v48 = vadd.f32 %v1887_v26, %v2458_v32 }
 0x23e   :  { %v489_v28 = vpop.f32.mrf.mxu1 }
 0x23f   :  { %v490_v29 = vadd.f32 %v489_v28, %v2454_v27  ;;  %v561_v59 = vadd.f32 %v2510_v33, %v498_v48  ;;  %v396_v48 = vpop.f32.mrf.mxu0 }
 0x240   :  { %v1888_v31 = vpop.f32.mrf.mxu1 }
 0x241   :  { %v559_v36 = vadd.f32 %v2510_v33, %v490_v29  ;;  %v501_v42 = vadd.f32 %v1888_v31, %v2460_v35  ;;  %v577_v61 = vmax.f32 %v561_v59, 0.0 }
 0x242   :  { %v492_v34 = vpop.f32.mrf.mxu1 }
 0x243   :  { %v493_v38 = vadd.f32 %v492_v34, %v2456_v30  ;;  %v575_v27 = vmax.f32 %v559_v36, 0.0  ;;  %v562_v54 = vadd.f32 %v2510_v33, %v501_v42 }
 0x244   :  { %v1891_v40 = vpop.f32.mrf.mxu1 }
 0x245   :  { %v560_v44 = vadd.f32 %v2510_v33, %v493_v38  ;;  %v578_v30 = vmax.f32 %v562_v54, 0.0  ;;  %v514_v8 = vadd.f32 %v1891_v40, %v2466_v41 }
 0x246   :  { %v505_v46 = vpop.f32.mrf.mxu1 }
 0x247   :  { %v576_v50 = vmax.f32 %v560_v44, 0.0  ;;  %v506_v62 = vadd.f32 %v505_v46, %v2462_v37  ;;  %v592_v63 = vpack.c.bf16 %v578_v30, %v577_v61  ;;  %v565_v13 = vadd.f32 %v2510_v33, %v514_v8 }
 0x248   :  { %v1892_v52 = vpop.f32.mrf.mxu1 }
 0x249   :  { %v591_v56 = vpack.c.bf16 %v576_v50, %v575_v27  ;;  %v563_v2 = vadd.f32 %v2510_v33, %v506_v62  ;;  %v517_v5 = vadd.f32 %v1892_v52, %v2468_v43  ;;  %v581_v20 = vmax.f32 %v565_v13, 0.0 }
 0x24a   :  { %v508_v58 = vpop.f32.mrf.mxu1 }
 0x24b   :  { %728 = vmatmul.mubr.bf16.vlgmr.msra.gmra.mxu1 %v591_v56  ;;  %v509_v35 = vadd.f32 %v508_v58, %v2464_v39  ;;  %v579_v39 = vmax.f32 %v563_v2, 0.0  ;;  %v566_v11 = vadd.f32 %v2510_v33, %v517_v5 }
 0x24c   :  { %737 = vmatprep.mubr.bf16.mxu1 %v2274_v0  ;;  %v1895_v60 = vpop.f32.mrf.mxu1 }
 0x24d   :  { %v564_v32 = vadd.f32 %v2510_v33, %v509_v35  ;;  %v582_v14 = vmax.f32 %v566_v11, 0.0  ;;  %v530_v29 = vadd.f32 %v1895_v60, %v2474_v49 }
 0x24e   :  { %v521_v1 = vpop.f32.mrf.mxu1 }
 0x24f   :  { %v580_v6 = vmax.f32 %v564_v32, 0.0  ;;  %v522_v43 = vadd.f32 %v521_v1, %v2470_v45  ;;  %v594_v41 = vpack.c.bf16 %v582_v14, %v581_v20  ;;  %v569_v36 = vadd.f32 %v2510_v33, %v530_v29 }
 0x250   :  { %v1896_v7 = vpop.f32.mrf.mxu1 }
 0x251   :  { %v593_v12 = vpack.c.bf16 %v580_v6, %v579_v39  ;;  %v567_v23 = vadd.f32 %v2510_v33, %v522_v43  ;;  %v533_v24 = vadd.f32 %v1896_v7, %v2476_v51  ;;  %v585_v42 = vmax.f32 %v569_v36, 0.0 }
 0x252   :  { %v524_v37 = vpop.f32.mrf.mxu1 }
 0x253   :  { %738 = vmatmul.mubr.bf16.gmra.mxu1 %v592_v63  ;;  %v525_v17 = vadd.f32 %v524_v37, %v2472_v47  ;;  %v583_v47 = vmax.f32 %v567_v23, 0.0  ;;  %v570_v31 = vadd.f32 %v2510_v33, %v533_v24 }
 0x254   :  { %747 = vmatprep.mubr.bf16.mxu1 %v2274_v0  ;;  %v1899_v19 = vpop.f32.mrf.mxu1 }
 0x255   :  { %v568_v21 = vadd.f32 %v2510_v33, %v525_v17  ;;  %v586_v38 = vmax.f32 %v570_v31, 0.0  ;;  %v546_v52 = vadd.f32 %v1899_v19, %v2482_v57 }
 0x256   :  { %v537_v22 = vpop.f32.mrf.mxu1 }
 0x257   :  { %v584_v26 = vmax.f32 %v568_v21, 0.0  ;;  %v538_v51 = vadd.f32 %v537_v22, %v2478_v53  ;;  %v596_v46 = vpack.c.bf16 %v586_v38, %v585_v42  ;;  %v573_v58 = vadd.f32 %v2510_v33, %v546_v52  ;;  %v2119_v42 = vld [vmem:[#allocation6 + $0x70] ss:$8 sps:$4 sm:$0xff]  }
 0x258   :  { %v1900_v28 = vpop.f32.mrf.mxu1  ;;  %v2131_v52 = vld [vmem:[#allocation6 + $0x30] ss:$8 sps:$4 sm:$0xff]  }
 0x259   :  { %v595_v34 = vpack.c.bf16 %v584_v26, %v583_v47  ;;  %v571_v49 = vadd.f32 %v2510_v33, %v538_v51  ;;  %v549_v27 = vadd.f32 %v1900_v28, %v396_v48  ;;  %v589_v59 = vmax.f32 %v573_v58, 0.0  ;;  %v2124_v51 = vld [vmem:[#allocation6 + $0x64] ss:$8 sps:$4 sm:$0xff]   ;;  %v2137_v58 = vld [vmem:[#allocation6 + $0x10] ss:$8 sps:$4 sm:$0xff]  }
 0x25a   :  { %v540_v45 = vpop.f32.mrf.mxu1  ;;  %v2130_v48 = vld [vmem:[#allocation6 + $0x44] ss:$8 sps:$4 sm:$0xff]  }
 0x25b   :  { %748 = vmatmul.mubr.bf16.gmra.mxu1 %v593_v12  ;;  %v541_v40 = vadd.f32 %v540_v45, %v2480_v55  ;;  %v587_v54 = vmax.f32 %v571_v49, 0.0  ;;  %v574_v56 = vadd.f32 %v2510_v33, %v549_v27  ;;  %v2125_v49 = vld [vmem:[#allocation6 + $0x50] ss:$8 sps:$4 sm:$0xff]   ;;  %v2128_v27 = vld [vmem:[#allocation6 + $0x40] ss:$8 sps:$4 sm:$0xff]  }
 0x25c   :  { %757 = vmatprep.mubr.bf16.mxu1 %v2274_v0 }
 0x25d   :  { %v572_v44 = vadd.f32 %v2510_v33, %v541_v40  ;;  %v590_v53 = vmax.f32 %v574_v56, 0.0  ;;  %v2121_v40 = vld [vmem:[#allocation6 + $0x74] ss:$8 sps:$4 sm:$0xff]   ;;  %v2134_v56 = vld [vmem:[#allocation6 + $0x20] ss:$8 sps:$4 sm:$0xff]  }
 0x25f   :  { %v588_v50 = vmax.f32 %v572_v44, 0.0  ;;  %v598_v30 = vpack.c.bf16 %v590_v53, %v589_v59  ;;  %v2122_v44 = vld [vmem:[#allocation6 + $0x60] ss:$8 sps:$4 sm:$0xff]   ;;  %v2142_v53 = vld [vmem:[#allocation6 + $0x4] ss:$8 sps:$4 sm:$0xff]  }
 0x260   :  { %v2140_v59 = vld [vmem:[#allocation6] ss:$8 sps:$4 sm:$0xff]  }
 0x261   :  { %v597_v55 = vpack.c.bf16 %v588_v50, %v587_v54  ;;  %v2133_v50 = vld [vmem:[#allocation6 + $0x34] ss:$8 sps:$4 sm:$0xff]   ;;  %v2136_v54 = vld [vmem:[#allocation6 + $0x24] ss:$8 sps:$4 sm:$0xff]  }
 0x263   :  { %758 = vmatmul.mubr.bf16.gmra.mxu1 %v594_v41 }
 0x264   :  { %767 = vmatprep.mubr.bf16.mxu1 %v2274_v0 }
 0x26b   :  { %768 = vmatmul.mubr.bf16.gmra.mxu1 %v595_v34 }
 0x26c   :  { %777 = vmatprep.mubr.bf16.mxu1 %v2274_v0 }
 0x273   :  { %778 = vmatmul.mubr.bf16.gmra.mxu1 %v596_v46  ;;  %v2127_v46 = vld [vmem:[#allocation6 + $0x54] ss:$8 sps:$4 sm:$0xff]  }
 0x274   :  { %787 = vmatprep.mubr.bf16.mxu1 %v2274_v0 }
 0x27b   :  { %788 = vmatmul.mubr.bf16.gmra.mxu1 %v597_v55  ;;  %v2139_v55 = vld [vmem:[#allocation6 + $0x14] ss:$8 sps:$4 sm:$0xff]  }
 0x27c   :  { %797 = vmatprep.mubr.bf16.mxu1 %v2274_v0 }
 0x283   :  { %798 = vmatmul.mubr.bf16.gmra.mxu1 %v598_v30 }
 0x284   :  { %1949 = vmatprep.mubr.bf16.mxu1 %v2450_v25 }
 0x30b   :  { %v729_v35 = vpop.f32.mrf.mxu1 }
 0x30d   :  { %v2550_v60 = vpop.f32.mrf.mxu1 }
 0x30f   :  { %v733_v61 = vpop.f32.mrf.mxu1 }
 0x310   :  { %v808_v57 = vpack.c.bf16 %v733_v61, %v729_v35 }
 0x311   :  { %v2552_v62 = vpop.f32.mrf.mxu1 }
 0x313   :  { %v739_v32 = vpop.f32.mrf.mxu1 }
 0x315   :  { %v2554_v63 = vpop.f32.mrf.mxu1 }
 0x317   :  { %v743_v33 = vpop.f32.mrf.mxu1 }
 0x318   :  { %v809_v1 = vpack.c.bf16 %v743_v33, %v739_v32  ;;  %v2592_v32 = vld [vmem:[%s2781_s5] ss:$0 sm:$0xff] }
 0x319   :  { %v2556_v2 = vpop.f32.mrf.mxu1 }
 0x31b   :  { %v749_v5 = vpop.f32.mrf.mxu1 }
 0x31d   :  { %v2558_v6 = vpop.f32.mrf.mxu1 }
 0x31f   :  { %v753_v7 = vpop.f32.mrf.mxu1 }
 0x320   :  { %v810_v38 = vpack.c.bf16 %v753_v7, %v749_v5 }
 0x321   :  { %v2560_v8 = vpop.f32.mrf.mxu1 }
 0x323   :  { %v759_v25 = vpop.f32.mrf.mxu1 }
 0x325   :  { %v2562_v39 = vpop.f32.mrf.mxu1 }
 0x327   :  { %v763_v11 = vpop.f32.mrf.mxu1 }
 0x328   :  { %v811_v36 = vpack.c.bf16 %v763_v11, %v759_v25 }
 0x329   :  { %v2564_v12 = vpop.f32.mrf.mxu1 }
 0x32b   :  { %v769_v37 = vpop.f32.mrf.mxu1 }
 0x32d   :  { %v2566_v13 = vpop.f32.mrf.mxu1 }
 0x32f   :  { %v773_v14 = vpop.f32.mrf.mxu1 }
 0x330   :  { %v812_v45 = vpack.c.bf16 %v773_v14, %v769_v37 }
 0x331   :  { %v2568_v17 = vpop.f32.mrf.mxu1 }
 0x333   :  { %v779_v19 = vpop.f32.mrf.mxu1 }
 0x335   :  { %v2570_v20 = vpop.f32.mrf.mxu1 }
 0x337   :  { %v783_v43 = vpop.f32.mrf.mxu1 }
 0x338   :  { %v813_v34 = vpack.c.bf16 %v783_v43, %v779_v19 }
 0x339   :  { %v2572_v21 = vpop.f32.mrf.mxu1 }
 0x33b   :  { %v789_v41 = vpop.f32.mrf.mxu1 }
 0x33d   :  { %v2574_v22 = vpop.f32.mrf.mxu1 }
 0x33f   :  { %v793_v23 = vpop.f32.mrf.mxu1 }
 0x340   :  { %v814_v31 = vpack.c.bf16 %v793_v23, %v789_v41 }
 0x341   :  { %v2576_v24 = vpop.f32.mrf.mxu1 }
 0x343   :  { %v799_v26 = vpop.f32.mrf.mxu1 }
 0x345   :  { %v2578_v28 = vpop.f32.mrf.mxu1 }
 0x347   :  { %v803_v29 = vpop.f32.mrf.mxu1 }
 0x348   :  { %v815_v47 = vpack.c.bf16 %v803_v29, %v799_v26 }
 0x34a   :  { %1901 = vmatprep.subr.bf16.mxu0 %v815_v47 }
 0x34b   :  { %1902 = vmatpush3.bf16.msra.mxu0 %v815_v47 }
 0x34c   :  { %1903 = vmatprep.subr.bf16.mxu0 %v814_v31 }
 0x34f   :  { %1904 = vmatpush3.bf16.msra.mxu0 %v814_v31 }
 0x350   :  { %1905 = vmatprep.subr.bf16.mxu0 %v813_v34 }
 0x353   :  { %1906 = vmatpush3.bf16.msra.mxu0 %v813_v34 }
 0x354   :  { %1907 = vmatprep.subr.bf16.mxu0 %v812_v45 }
 0x357   :  { %1908 = vmatpush3.bf16.msra.mxu0 %v812_v45 }
 0x358   :  { %1909 = vmatprep.subr.bf16.mxu0 %v811_v36 }
 0x35b   :  { %1910 = vmatpush3.bf16.msra.mxu0 %v811_v36 }
 0x35c   :  { %1911 = vmatprep.subr.bf16.mxu0 %v810_v38 }
 0x35f   :  { %1912 = vmatpush3.bf16.msra.mxu0 %v810_v38 }
 0x360   :  { %1913 = vmatprep.subr.bf16.mxu0 %v809_v1 }
 0x363   :  { %1914 = vmatpush3.bf16.msra.mxu0 %v809_v1 }
 0x364   :  { %1915 = vmatprep.subr.bf16.mxu0 %v808_v57 }
 0x367   :  { %1916 = vmatpush3.bf16.msra.mxu0 %v808_v57 }
 0x368   :  { %1056 = vmatprep.subr.bf16.mxu0 %v2121_v40 }
 0x36a   :  { %1918 = vmatmul.mubr.bf16.vlgmr.msra.gmra.mxu0 %v2484_v3 }
 0x36b   :  { %1921 = vmatprep.mubr.bf16.mxu0 %v2486_v4  ;;  %1057 = vmatpush1.bf16.msra.mxu0 %v2119_v42 }
 0x36c   :  { %1058 = vmatprep.subr.bf16.mxu0 %v2124_v51 }
 0x36f   :  { %1059 = vmatpush1.bf16.msra.mxu0 %v2122_v44 }
 0x370   :  { %1060 = vmatprep.subr.bf16.mxu0 %v2127_v46 }
 0x372   :  { %1922 = vmatmul.mubr.bf16.gmra.mxu0 %v2490_v9 }
 0x373   :  { %1925 = vmatprep.mubr.bf16.mxu0 %v2492_v10  ;;  %1061 = vmatpush1.bf16.msra.mxu0 %v2125_v49 }
 0x374   :  { %1062 = vmatprep.subr.bf16.mxu0 %v2130_v48 }
 0x377   :  { %1063 = vmatpush1.bf16.msra.mxu0 %v2128_v27 }
 0x378   :  { %1064 = vmatprep.subr.bf16.mxu0 %v2133_v50 }
 0x37a   :  { %1926 = vmatmul.mubr.bf16.gmra.mxu0 %v2496_v15 }
 0x37b   :  { %1929 = vmatprep.mubr.bf16.mxu0 %v2498_v16  ;;  %1065 = vmatpush1.bf16.msra.mxu0 %v2131_v52 }
 0x37c   :  { %1066 = vmatprep.subr.bf16.mxu0 %v2136_v54 }
 0x37f   :  { %1067 = vmatpush1.bf16.msra.mxu0 %v2134_v56 }
 0x380   :  { %1068 = vmatprep.subr.bf16.mxu0 %v2139_v55 }
 0x382   :  { %1930 = vmatmul.mubr.bf16.gmra.mxu0 %v2502_v18 }
 0x383   :  { %1088 = vmatprep.mubr.bf16.mxu0 %v2274_v0  ;;  %1069 = vmatpush1.bf16.msra.mxu0 %v2137_v58 }
 0x384   :  { %1070 = vmatprep.subr.bf16.mxu0 %v2142_v53 }
 0x387   :  { %1071 = vmatpush1.bf16.msra.mxu0 %v2140_v59 }
 0x42a   :  { %v1919_v30 = vpop.f32.mrf.mxu0 }
 0x42b   :  { %v859_v14 = vadd.f32 %v1919_v30, %v2554_v63 }
 0x42c   :  { %v850_v35 = vpop.f32.mrf.mxu0 }
 0x42d   :  { %v851_v61 = vadd.f32 %v850_v35, %v2550_v60  ;;  %v922_v29 = vadd.f32 %v2592_v32, %v859_v14 }
 0x42e   :  { %v1920_v57 = vpop.f32.mrf.mxu0 }
 0x42f   :  { %v920_v1 = vadd.f32 %v2592_v32, %v851_v61  ;;  %v862_v25 = vadd.f32 %v1920_v57, %v2556_v2  ;;  %v938_v31 = vmax.f32 %v922_v29, 0.0 }
 0x430   :  { %v853_v33 = vpop.f32.mrf.mxu0 }
 0x431   :  { %v854_v5 = vadd.f32 %v853_v33, %v2552_v62  ;;  %v936_v60 = vmax.f32 %v920_v1, 0.0  ;;  %v923_v41 = vadd.f32 %v2592_v32, %v862_v25 }
 0x432   :  { %v1923_v7 = vpop.f32.mrf.mxu0 }
 0x433   :  { %v921_v11 = vadd.f32 %v2592_v32, %v854_v5  ;;  %v939_v62 = vmax.f32 %v923_v41, 0.0  ;;  %v875_v44 = vadd.f32 %v1923_v7, %v2562_v39 }
 0x434   :  { %v866_v37 = vpop.f32.mrf.mxu0 }
 0x435   :  { %v937_v19 = vmax.f32 %v921_v11, 0.0  ;;  %v867_v34 = vadd.f32 %v866_v37, %v2558_v6  ;;  %v953_v45 = vpack.c.bf16 %v939_v62, %v938_v31  ;;  %v926_v48 = vadd.f32 %v2592_v32, %v875_v44  ;;  %v805_v37 = vpop.f32.mrf.mxu1 }
 0x436   :  { %v1924_v43 = vpop.f32.mrf.mxu0 }
 0x437   :  { %v952_v23 = vpack.c.bf16 %v937_v19, %v936_v60  ;;  %v924_v38 = vadd.f32 %v2592_v32, %v867_v34  ;;  %v878_v40 = vadd.f32 %v1924_v43, %v2564_v12  ;;  %v942_v54 = vmax.f32 %v926_v48, 0.0 }
 0x438   :  { %v869_v26 = vpop.f32.mrf.mxu0 }
 0x439   :  { %1089 = vmatmul.mubr.bf16.vlgmr.msra.gmra.mxu0 %v952_v23  ;;  %v870_v2 = vadd.f32 %v869_v26, %v2560_v8  ;;  %v940_v8 = vmax.f32 %v924_v38, 0.0  ;;  %v927_v46 = vadd.f32 %v2592_v32, %v878_v40 }
 0x43a   :  { %1098 = vmatprep.mubr.bf16.mxu0 %v2274_v0  ;;  %v1927_v47 = vpop.f32.mrf.mxu0 }
 0x43b   :  { %v925_v63 = vadd.f32 %v2592_v32, %v870_v2  ;;  %v943_v27 = vmax.f32 %v927_v46, 0.0  ;;  %v891_v35 = vadd.f32 %v1927_v47, %v2570_v20 }
 0x43c   :  { %v882_v36 = vpop.f32.mrf.mxu0 }
 0x43d   :  { %v941_v42 = vmax.f32 %v925_v63, 0.0  ;;  %v883_v12 = vadd.f32 %v882_v36, %v2566_v13  ;;  %v955_v39 = vpack.c.bf16 %v943_v27, %v942_v54  ;;  %v930_v33 = vadd.f32 %v2592_v32, %v891_v35 }
 0x43e   :  { %v1928_v51 = vpop.f32.mrf.mxu0 }
 0x43f   :  { %v954_v49 = vpack.c.bf16 %v941_v42, %v940_v8  ;;  %v928_v58 = vadd.f32 %v2592_v32, %v883_v12  ;;  %v894_v53 = vadd.f32 %v1928_v51, %v2572_v21  ;;  %v946_v7 = vmax.f32 %v930_v33, 0.0 }
 0x440   :  { %v885_v6 = vpop.f32.mrf.mxu0 }
 0x441   :  { %1099 = vmatmul.mubr.bf16.gmra.mxu0 %v953_v45  ;;  %v886_v50 = vadd.f32 %v885_v6, %v2568_v17  ;;  %v944_v17 = vmax.f32 %v928_v58, 0.0  ;;  %v931_v61 = vadd.f32 %v2592_v32, %v894_v53 }
 0x442   :  { %1108 = vmatprep.mubr.bf16.mxu0 %v2274_v0  ;;  %v1931_v52 = vpop.f32.mrf.mxu0 }
 0x443   :  { %v929_v56 = vadd.f32 %v2592_v32, %v886_v50  ;;  %v947_v1 = vmax.f32 %v931_v61, 0.0  ;;  %v907_v19 = vadd.f32 %v1931_v52, %v2578_v28 }
 0x444   :  { %v898_v55 = vpop.f32.mrf.mxu0 }
 0x445   :  { %v945_v59 = vmax.f32 %v929_v56, 0.0  ;;  %v899_v21 = vadd.f32 %v898_v55, %v2574_v22  ;;  %v957_v11 = vpack.c.bf16 %v947_v1, %v946_v7  ;;  %v934_v23 = vadd.f32 %v2592_v32, %v907_v19  ;;  %v2143_v1 = vld [vmem:[#allocation7 + $0x38] sm:$0xff]   ;;  %v2145_v7 = vld [vmem:[#allocation7 + $0x28] sm:$0xff]  }
 0x446   :  { %v1932_v30 = vpop.f32.mrf.mxu0 }
 0x447   :  { %v956_v57 = vpack.c.bf16 %v945_v59, %v944_v17  ;;  %v932_v20 = vadd.f32 %v2592_v32, %v899_v21  ;;  %v910_v14 = vadd.f32 %v1932_v30, %v805_v37  ;;  %v950_v26 = vmax.f32 %v934_v23, 0.0  ;;  %v2146_v21 = vld [vmem:[#allocation7 + $0x20] sm:$0xff]  }
 0x448   :  { %v901_v13 = vpop.f32.mrf.mxu0 }
 0x449   :  { %1109 = vmatmul.mubr.bf16.gmra.mxu0 %v954_v49  ;;  %v902_v5 = vadd.f32 %v901_v13, %v2576_v24  ;;  %v948_v43 = vmax.f32 %v932_v20, 0.0  ;;  %v935_v41 = vadd.f32 %v2592_v32, %v910_v14 }
 0x44a   :  { %1118 = vmatprep.mubr.bf16.mxu0 %v2274_v0 }
 0x44b   :  { %v933_v25 = vadd.f32 %v2592_v32, %v902_v5  ;;  %v951_v22 = vmax.f32 %v935_v41, 0.0  ;;  %v2144_v5 = vld [vmem:[#allocation7 + $0x30] sm:$0xff]  }
 0x44d   :  { %v949_v60 = vmax.f32 %v933_v25, 0.0  ;;  %v959_v29 = vpack.c.bf16 %v951_v22, %v950_v26  ;;  %v2149_v25 = vld [vmem:[#allocation7 + $0x8] sm:$0xff]  }
 0x44f   :  { %v958_v24 = vpack.c.bf16 %v949_v60, %v948_v43  ;;  %v2685_v43 = vld [vmem:[%s2783_s7] ss:$0 sm:$0xff] }
 0x451   :  { %1119 = vmatmul.mubr.bf16.gmra.mxu0 %v955_v39 }
 0x452   :  { %1128 = vmatprep.mubr.bf16.mxu0 %v2274_v0 }
 0x459   :  { %1129 = vmatmul.mubr.bf16.gmra.mxu0 %v956_v57 }
 0x45a   :  { %1138 = vmatprep.mubr.bf16.mxu0 %v2274_v0 }
 0x461   :  { %1139 = vmatmul.mubr.bf16.gmra.mxu0 %v957_v11  ;;  %v2152_v11 = vld [vmem:[#allocation9 + $0x30] sm:$0xff]  }
 0x462   :  { %1148 = vmatprep.mubr.bf16.mxu0 %v2274_v0 }
 0x469   :  { %1149 = vmatmul.mubr.bf16.gmra.mxu0 %v958_v24 }
 0x46a   :  { %1158 = vmatprep.mubr.bf16.mxu0 %v2274_v0 }
 0x471   :  { %1159 = vmatmul.mubr.bf16.gmra.mxu0 %v959_v29 }
 0x4f9   :  { %v1090_v62 = vpop.f32.mrf.mxu0 }
 0x4fb   :  { %v2631_v2 = vpop.f32.mrf.mxu0 }
 0x4fd   :  { %v1094_v47 = vpop.f32.mrf.mxu0 }
 0x4fe   :  { %v1169_v31 = vpack.c.bf16 %v1094_v47, %v1090_v62 }
 0x4ff   :  { %v2633_v34 = vpop.f32.mrf.mxu0 }
 0x501   :  { %v1100_v28 = vpop.f32.mrf.mxu0 }
 0x503   :  { %v2635_v63 = vpop.f32.mrf.mxu0 }
 0x505   :  { %v1104_v45 = vpop.f32.mrf.mxu0 }
 0x506   :  { %v1170_v36 = vpack.c.bf16 %v1104_v45, %v1100_v28 }
 0x507   :  { %v2637_v32 = vpop.f32.mrf.mxu0 }
 0x509   :  { %v1110_v38 = vpop.f32.mrf.mxu0 }
 0x50b   :  { %v2639_v0 = vpop.f32.mrf.mxu0 }
 0x50d   :  { %v1114_v40 = vpop.f32.mrf.mxu0 }
 0x50e   :  { %v1171_v33 = vpack.c.bf16 %v1114_v40, %v1110_v38 }
 0x50f   :  { %v2641_v42 = vpop.f32.mrf.mxu0 }
 0x511   :  { %v1120_v51 = vpop.f32.mrf.mxu0 }
 0x513   :  { %v2643_v44 = vpop.f32.mrf.mxu0 }
 0x515   :  { %v1124_v8 = vpop.f32.mrf.mxu0 }
 0x516   :  { %v1172_v13 = vpack.c.bf16 %v1124_v8, %v1120_v51 }
 0x517   :  { %v2645_v46 = vpop.f32.mrf.mxu0 }
 0x519   :  { %v1130_v49 = vpop.f32.mrf.mxu0 }
 0x51b   :  { %v2647_v6 = vpop.f32.mrf.mxu0 }
 0x51d   :  { %v1134_v48 = vpop.f32.mrf.mxu0 }
 0x51e   :  { %v1173_v57 = vpack.c.bf16 %v1134_v48, %v1130_v49 }
 0x51f   :  { %v2649_v27 = vpop.f32.mrf.mxu0 }
 0x521   :  { %v1140_v50 = vpop.f32.mrf.mxu0 }
 0x523   :  { %v2651_v52 = vpop.f32.mrf.mxu0 }
 0x525   :  { %v1144_v54 = vpop.f32.mrf.mxu0 }
 0x526   :  { %v1174_v61 = vpack.c.bf16 %v1144_v54, %v1140_v50 }
 0x527   :  { %v2653_v12 = vpop.f32.mrf.mxu0 }
 0x529   :  { %v1150_v56 = vpop.f32.mrf.mxu0 }
 0x52b   :  { %v2655_v39 = vpop.f32.mrf.mxu0 }
 0x52d   :  { %v1154_v55 = vpop.f32.mrf.mxu0 }
 0x52e   :  { %v1175_v17 = vpack.c.bf16 %v1154_v55, %v1150_v56 }
 0x52f   :  { %v2657_v58 = vpop.f32.mrf.mxu0 }
 0x531   :  { %v1160_v53 = vpop.f32.mrf.mxu0 }
 0x533   :  { %v2659_v59 = vpop.f32.mrf.mxu0 }
 0x535   :  { %v1164_v30 = vpop.f32.mrf.mxu0 }
 0x536   :  { %v1176_v35 = vpack.c.bf16 %v1164_v30, %v1160_v53 }
 0x538   :  { %1933 = vmatprep.subr.bf16.mxu1 %v1176_v35 }
 0x539   :  { %1934 = vmatpush3.bf16.msra.mxu1 %v1176_v35 }
 0x53a   :  { %1935 = vmatprep.subr.bf16.mxu1 %v1175_v17 }
 0x53d   :  { %1936 = vmatpush3.bf16.msra.mxu1 %v1175_v17 }
 0x53e   :  { %1937 = vmatprep.subr.bf16.mxu1 %v1174_v61 }
 0x541   :  { %1938 = vmatpush3.bf16.msra.mxu1 %v1174_v61 }
 0x542   :  { %1939 = vmatprep.subr.bf16.mxu1 %v1173_v57 }
 0x545   :  { %1940 = vmatpush3.bf16.msra.mxu1 %v1173_v57 }
 0x546   :  { %1941 = vmatprep.subr.bf16.mxu1 %v1172_v13 }
 0x549   :  { %1942 = vmatpush3.bf16.msra.mxu1 %v1172_v13 }
 0x54a   :  { %1943 = vmatprep.subr.bf16.mxu1 %v1171_v33 }
 0x54d   :  { %1944 = vmatpush3.bf16.msra.mxu1 %v1171_v33 }
 0x54e   :  { %1945 = vmatprep.subr.bf16.mxu1 %v1170_v36 }
 0x551   :  { %1946 = vmatpush3.bf16.msra.mxu1 %v1170_v36 }
 0x552   :  { %1947 = vmatprep.subr.bf16.mxu1 %v1169_v31 }
 0x555   :  { %1948 = vmatpush3.bf16.msra.mxu1 %v1169_v31 }
 0x556   :  { %1965 = vmatprep.subr.bf16.mxu1 %v2143_v1 }
 0x558   :  { %1950 = vmatmul.mubr.bf16.vlgmr.msra.gmra.mxu1 %v2484_v3  ;;  %v2147_v3 = vld [vmem:[#allocation7 + $0x18] sm:$0xff]  }
 0x559   :  { %1953 = vmatprep.mubr.bf16.mxu1 %v2486_v4  ;;  %1966 = vmatpush3.bf16.msra.mxu1 %v2143_v1  ;;  %v2148_v4 = vld [vmem:[#allocation7 + $0x10] sm:$0xff]  }
 0x55a   :  { %1967 = vmatprep.subr.bf16.mxu1 %v2144_v5 }
 0x55d   :  { %1968 = vmatpush3.bf16.msra.mxu1 %v2144_v5 }
 0x55e   :  { %1969 = vmatprep.subr.bf16.mxu1 %v2145_v7 }
 0x560   :  { %1954 = vmatmul.mubr.bf16.gmra.mxu1 %v2490_v9  ;;  %v2150_v9 = vld [vmem:[#allocation7] sm:$0xff]  }
 0x561   :  { %1957 = vmatprep.mubr.bf16.mxu1 %v2492_v10  ;;  %1970 = vmatpush3.bf16.msra.mxu1 %v2145_v7  ;;  %v2151_v10 = vld [vmem:[#allocation9 + $0x38] sm:$0xff]  }
 0x562   :  { %1971 = vmatprep.subr.bf16.mxu1 %v2146_v21  ;;  %1997 = vmatprep.subr.bf16.mxu0 %v2151_v10 }
 0x563   :  { %1998 = vmatpush3.bf16.msra.mxu0 %v2151_v10 }
 0x564   :  { %1999 = vmatprep.subr.bf16.mxu0 %v2152_v11 }
 0x565   :  { %1972 = vmatpush3.bf16.msra.mxu1 %v2146_v21 }
 0x566   :  { %1973 = vmatprep.subr.bf16.mxu1 %v2147_v3 }
 0x567   :  { %2000 = vmatpush3.bf16.msra.mxu0 %v2152_v11 }
 0x568   :  { %1958 = vmatmul.mubr.bf16.gmra.mxu1 %v2496_v15  ;;  %v2668_v15 = vld [vmem:[#allocation9 + $0x28] sm:$0xff]  }
 0x569   :  { %1961 = vmatprep.mubr.bf16.mxu1 %v2498_v16  ;;  %1974 = vmatpush3.bf16.msra.mxu1 %v2147_v3  ;;  %v2671_v16 = vld [vmem:[#allocation9 + $0x20] sm:$0xff]  }
 0x56a   :  { %1975 = vmatprep.subr.bf16.mxu1 %v2148_v4  ;;  %2001 = vmatprep.subr.bf16.mxu0 %v2668_v15 }
 0x56b   :  { %2002 = vmatpush3.bf16.msra.mxu0 %v2668_v15 }
 0x56c   :  { %2003 = vmatprep.subr.bf16.mxu0 %v2671_v16 }
 0x56d   :  { %1976 = vmatpush3.bf16.msra.mxu1 %v2148_v4 }
 0x56e   :  { %1977 = vmatprep.subr.bf16.mxu1 %v2149_v25 }
 0x56f   :  { %2004 = vmatpush3.bf16.msra.mxu0 %v2671_v16 }
 0x570   :  { %1962 = vmatmul.mubr.bf16.gmra.mxu1 %v2502_v18  ;;  %v2675_v18 = vld [vmem:[#allocation9 + $0x18] sm:$0xff]  }
 0x571   :  { %1978 = vmatpush3.bf16.msra.mxu1 %v2149_v25  ;;  %2005 = vmatprep.subr.bf16.mxu0 %v2675_v18 }
 0x572   :  { %1979 = vmatprep.subr.bf16.mxu1 %v2150_v9 }
 0x573   :  { %2006 = vmatpush3.bf16.msra.mxu0 %v2675_v18 }
 0x575   :  { %1980 = vmatpush3.bf16.msra.mxu1 %v2150_v9 }
 0x576   :  { %2029 = vmatprep.subr.bf16.mxu1 %v2151_v10 }
 0x618   :  { %v1951_v20 = vpop.f32.mrf.mxu1 }
 0x619   :  { %v1220_v60 = vadd.f32 %v1951_v20, %v2635_v63 }
 0x61a   :  { %v1211_v37 = vpop.f32.mrf.mxu1 }
 0x61b   :  { %v1212_v14 = vadd.f32 %v1211_v37, %v2631_v2  ;;  %v1283_v29 = vadd.f32 %v2685_v43, %v1220_v60 }
 0x61c   :  { %v1952_v19 = vpop.f32.mrf.mxu1 }
 0x61d   :  { %v1223_v41 = vadd.f32 %v1952_v19, %v2637_v32  ;;  %v1281_v23 = vadd.f32 %v2685_v43, %v1212_v14  ;;  %v1299_v36 = vmax.f32 %v1283_v29, 0.0 }
 0x61e   :  { %v1214_v24 = vpop.f32.mrf.mxu1 }
 0x61f   :  { %v1284_v22 = vadd.f32 %v2685_v43, %v1223_v41  ;;  %v1215_v26 = vadd.f32 %v1214_v24, %v2633_v34  ;;  %v1297_v28 = vmax.f32 %v1281_v23, 0.0 }
 0x620   :  { %v1955_v62 = vpop.f32.mrf.mxu1 }
 0x621   :  { %v1282_v2 = vadd.f32 %v2685_v43, %v1215_v26  ;;  %v1300_v47 = vmax.f32 %v1284_v22, 0.0  ;;  %v1236_v32 = vadd.f32 %v1955_v62, %v2643_v44 }
 0x622   :  { %v1227_v31 = vpop.f32.mrf.mxu1 }
 0x623   :  { %v1298_v63 = vmax.f32 %v1282_v2, 0.0  ;;  %v1228_v45 = vadd.f32 %v1227_v31, %v2639_v0  ;;  %v1314_v8 = vpack.c.bf16 %v1300_v47, %v1299_v36  ;;  %v1287_v54 = vadd.f32 %v2685_v43, %v1236_v32  ;;  %v2156_v2 = vld [vmem:[#allocation9 + $0x10] sm:$0xff]   ;;  %v1771_v31 = vld [vmem:[%s2785_s9] ss:$0 sm:$0xff] }
 0x624   :  { %v1956_v38 = vpop.f32.mrf.mxu1  ;;  %2007 = vmatprep.subr.bf16.mxu0 %v2156_v2 }
 0x625   :  { %v1239_v40 = vadd.f32 %v1956_v38, %v2645_v46  ;;  %v1313_v51 = vpack.c.bf16 %v1298_v63, %v1297_v28  ;;  %v1285_v49 = vadd.f32 %v2685_v43, %v1228_v45  ;;  %v1303_v35 = vmax.f32 %v1287_v54, 0.0  ;;  %2008 = vmatpush3.bf16.msra.mxu0 %v2156_v2 }
 0x626   :  { %v1230_v34 = vpop.f32.mrf.mxu1 }
 0x627   :  { %v1288_v48 = vadd.f32 %v2685_v43, %v1239_v40  ;;  %v1231_v50 = vadd.f32 %v1230_v34, %v2641_v42  ;;  %1981 = vmatprep.mubr.bf16.mxu1 %v1313_v51  ;;  %v1301_v46 = vmax.f32 %v1285_v49, 0.0 }
 0x628   :  { %v1959_v56 = vpop.f32.mrf.mxu1  ;;  %1982 = vmatmul.mubr.bf16.vlgmr.msra.gmra.mxu1 %v1314_v8 }
 0x629   :  { %v1286_v0 = vadd.f32 %v2685_v43, %v1231_v50  ;;  %2037 = vmatpush3.bf16.msra.mxu1 %v2151_v10  ;;  %v1304_v44 = vmax.f32 %v1288_v48, 0.0  ;;  %v1252_v17 = vadd.f32 %v1959_v56, %v2651_v52  ;;  %v1166_v10 = vpop.f32.mrf.mxu0 }
 0x62a   :  { %v1243_v55 = vpop.f32.mrf.mxu1  ;;  %2030 = vmatprep.subr.bf16.mxu1 %v2152_v11 }
 0x62b   :  { %v1302_v53 = vmax.f32 %v1286_v0, 0.0  ;;  %v1244_v30 = vadd.f32 %v1243_v55, %v2647_v6  ;;  %v1316_v33 = vpack.c.bf16 %v1304_v44, %v1303_v35  ;;  %v1291_v6 = vadd.f32 %v2685_v43, %v1252_v17 }
 0x62c   :  { %v1960_v61 = vpop.f32.mrf.mxu1 }
 0x62d   :  { %v1255_v42 = vadd.f32 %v1960_v61, %v2653_v12  ;;  %v1315_v57 = vpack.c.bf16 %v1302_v53, %v1301_v46  ;;  %2038 = vmatpush3.bf16.msra.mxu1 %v2152_v11  ;;  %v1289_v1 = vadd.f32 %v2685_v43, %v1244_v30  ;;  %v1307_v11 = vmax.f32 %v1291_v6, 0.0 }
 0x62e   :  { %v1246_v13 = vpop.f32.mrf.mxu1  ;;  %2031 = vmatprep.subr.bf16.mxu1 %v2668_v15 }
 0x62f   :  { %v1292_v5 = vadd.f32 %v2685_v43, %v1255_v42  ;;  %v1247_v7 = vadd.f32 %v1246_v13, %v2649_v27  ;;  %1985 = vmatprep.mubr.bf16.mxu1 %v1315_v57  ;;  %v1305_v4 = vmax.f32 %v1289_v1, 0.0 }
 0x630   :  { %v1963_v21 = vpop.f32.mrf.mxu1  ;;  %1986 = vmatmul.mubr.bf16.gmra.mxu1 %v1316_v33 }
 0x631   :  { %v1290_v52 = vadd.f32 %v2685_v43, %v1247_v7  ;;  %2039 = vmatpush3.bf16.msra.mxu1 %v2668_v15  ;;  %v1308_v12 = vmax.f32 %v1292_v5, 0.0  ;;  %v1268_v27 = vadd.f32 %v1963_v21, %v2659_v59 }
 0x632   :  { %v1259_v3 = vpop.f32.mrf.mxu1  ;;  %2032 = vmatprep.subr.bf16.mxu1 %v2671_v16 }
 0x633   :  { %v1306_v25 = vmax.f32 %v1290_v52, 0.0  ;;  %v1260_v9 = vadd.f32 %v1259_v3, %v2655_v39  ;;  %v1318_v19 = vpack.c.bf16 %v1308_v12, %v1307_v11  ;;  %v1295_v39 = vadd.f32 %v2685_v43, %v1268_v27 }
 0x634   :  { %v1964_v20 = vpop.f32.mrf.mxu1 }
 0x635   :  { %v1271_v37 = vadd.f32 %v1964_v20, %v1166_v10  ;;  %v1317_v14 = vpack.c.bf16 %v1306_v25, %v1305_v4  ;;  %2040 = vmatpush3.bf16.msra.mxu1 %v2671_v16  ;;  %v1293_v15 = vadd.f32 %v2685_v43, %v1260_v9  ;;  %v1311_v26 = vmax.f32 %v1295_v39, 0.0 }
 0x636   :  { %v1262_v60 = vpop.f32.mrf.mxu1  ;;  %2033 = vmatprep.subr.bf16.mxu1 %v2675_v18 }
 0x637   :  { %v1296_v41 = vadd.f32 %v2685_v43, %v1271_v37  ;;  %v1263_v24 = vadd.f32 %v1262_v60, %v2657_v58  ;;  %1989 = vmatprep.mubr.bf16.mxu1 %v1317_v14  ;;  %v1309_v16 = vmax.f32 %v1293_v15, 0.0  ;;  %v2157_v58 = vld [vmem:[#allocation9 + $0x8] sm:$0xff]  }
 0x638   :  { %1990 = vmatmul.mubr.bf16.gmra.mxu1 %v1318_v19  ;;  %2009 = vmatprep.subr.bf16.mxu0 %v2157_v58 }
 0x639   :  { %v1294_v59 = vadd.f32 %v2685_v43, %v1263_v24  ;;  %2041 = vmatpush3.bf16.msra.mxu1 %v2675_v18  ;;  %v1312_v23 = vmax.f32 %v1296_v41, 0.0  ;;  %2010 = vmatpush3.bf16.msra.mxu0 %v2157_v58  ;;  %v2158_v43 = vld [vmem:[#allocation9] sm:$0xff]  }
 0x63a   :  { %2034 = vmatprep.subr.bf16.mxu1 %v2156_v2  ;;  %2011 = vmatprep.subr.bf16.mxu0 %v2158_v43 }
 0x63b   :  { %v1310_v22 = vmax.f32 %v1294_v59, 0.0  ;;  %v1320_v62 = vpack.c.bf16 %v1312_v23, %v1311_v26 }
 0x63d   :  { %v1319_v29 = vpack.c.bf16 %v1310_v22, %v1309_v16  ;;  %2042 = vmatpush3.bf16.msra.mxu1 %v2156_v2  ;;  %2012 = vmatpush3.bf16.msra.mxu0 %v2158_v43  ;;  %v1780_v22 = vld [vmem:[%s2787_s11] ss:$0 sm:$0xff] }
 0x63e   :  { %2035 = vmatprep.subr.bf16.mxu1 %v2157_v58 }
 0x63f   :  { %1993 = vmatprep.mubr.bf16.mxu1 %v1319_v29 }
 0x640   :  { %1994 = vmatmul.mubr.bf16.gmra.mxu1 %v1320_v62 }
 0x641   :  { %2043 = vmatpush3.bf16.msra.mxu1 %v2157_v58 }
 0x642   :  { %2036 = vmatprep.subr.bf16.mxu1 %v2158_v43 }
 0x645   :  { %2044 = vmatpush3.bf16.msra.mxu1 %v2158_v43 }
 0x6e8   :  { %v1983_v18 = vpop.f32.mrf.mxu1 }
 0x6e9   :  { %v1435_v36 = vadd.f32 %v1983_v18, %v1771_v31 }
 0x6ea   :  { %v1426_v47 = vpop.f32.mrf.mxu1 }
 0x6eb   :  { %v1427_v63 = vadd.f32 %v1771_v31, %v1426_v47  ;;  %v1491_v49 = vmax.f32 %v1435_v36, 0.0 }
 0x6ec   :  { %v1984_v28 = vpop.f32.mrf.mxu1 }
 0x6ed   :  { %v1438_v45 = vadd.f32 %v1984_v28, %v1771_v31  ;;  %v1489_v8 = vmax.f32 %v1427_v63, 0.0 }
 0x6ee   :  { %v1429_v32 = vpop.f32.mrf.mxu1 }
 0x6ef   :  { %v1430_v38 = vadd.f32 %v1771_v31, %v1429_v32  ;;  %v1492_v40 = vmax.f32 %v1438_v45, 0.0 }
 0x6f0   :  { %v1987_v51 = vpop.f32.mrf.mxu1 }
 0x6f1   :  { %v1490_v34 = vmax.f32 %v1430_v38, 0.0  ;;  %v1506_v54 = vpack.c.bf16 %v1492_v40, %v1491_v49  ;;  %v1451_v55 = vadd.f32 %v1987_v51, %v1771_v31 }
 0x6f2   :  { %v1442_v48 = vpop.f32.mrf.mxu1 }
 0x6f3   :  { %v1505_v50 = vpack.c.bf16 %v1490_v34, %v1489_v8  ;;  %v1443_v0 = vadd.f32 %v1771_v31, %v1442_v48  ;;  %v1495_v42 = vmax.f32 %v1451_v55, 0.0 }
 0x6f4   :  { %v1988_v56 = vpop.f32.mrf.mxu1 }
 0x6f5   :  { %v1454_v44 = vadd.f32 %v1988_v56, %v1771_v31  ;;  %2013 = vmatprep.mubr.bf16.mxu0 %v1505_v50  ;;  %v1493_v17 = vmax.f32 %v1443_v0, 0.0 }
 0x6f6   :  { %v1445_v46 = vpop.f32.mrf.mxu1  ;;  %2014 = vmatmul.mubr.bf16.vlgmr.msra.gmra.mxu0 %v1506_v54 }
 0x6f7   :  { %v1446_v53 = vadd.f32 %v1771_v31, %v1445_v46  ;;  %v1496_v30 = vmax.f32 %v1454_v44, 0.0 }
 0x6f8   :  { %v1991_v35 = vpop.f32.mrf.mxu1 }
 0x6f9   :  { %v1494_v61 = vmax.f32 %v1446_v53, 0.0  ;;  %v1508_v33 = vpack.c.bf16 %v1496_v30, %v1495_v42  ;;  %v1467_v6 = vadd.f32 %v1991_v35, %v1771_v31 }
 0x6fa   :  { %v1458_v57 = vpop.f32.mrf.mxu1 }
 0x6fb   :  { %v1507_v13 = vpack.c.bf16 %v1494_v61, %v1493_v17  ;;  %v1459_v5 = vadd.f32 %v1771_v31, %v1458_v57  ;;  %v1499_v9 = vmax.f32 %v1467_v6, 0.0 }
 0x6fc   :  { %v1992_v1 = vpop.f32.mrf.mxu1 }
 0x6fd   :  { %v1470_v7 = vadd.f32 %v1992_v1, %v1771_v31  ;;  %2017 = vmatprep.mubr.bf16.mxu0 %v1507_v13  ;;  %v1497_v4 = vmax.f32 %v1459_v5, 0.0 }
 0x6fe   :  { %v1461_v21 = vpop.f32.mrf.mxu1  ;;  %2018 = vmatmul.mubr.bf16.gmra.mxu0 %v1508_v33 }
 0x6ff   :  { %v1462_v52 = vadd.f32 %v1771_v31, %v1461_v21  ;;  %v1500_v12 = vmax.f32 %v1470_v7, 0.0 }
 0x700   :  { %v1995_v3 = vpop.f32.mrf.mxu1 }
 0x701   :  { %v1498_v25 = vmax.f32 %v1462_v52, 0.0  ;;  %v1510_v27 = vpack.c.bf16 %v1500_v12, %v1499_v9  ;;  %v1483_v60 = vadd.f32 %v1995_v3, %v1771_v31 }
 0x702   :  { %v1474_v10 = vpop.f32.mrf.mxu1 }
 0x703   :  { %v1509_v11 = vpack.c.bf16 %v1498_v25, %v1497_v4  ;;  %v1475_v37 = vadd.f32 %v1771_v31, %v1474_v10  ;;  %v1503_v59 = vmax.f32 %v1483_v60, 0.0 }
 0x704   :  { %v1996_v20 = vpop.f32.mrf.mxu1 }
 0x705   :  { %v1486_v14 = vadd.f32 %v1996_v20, %v1771_v31  ;;  %2021 = vmatprep.mubr.bf16.mxu1 %v1509_v11  ;;  %v1501_v24 = vmax.f32 %v1475_v37, 0.0 }
 0x706   :  { %v1477_v19 = vpop.f32.mrf.mxu1  ;;  %2022 = vmatmul.mubr.bf16.vlgmr.msra.gmra.mxu1 %v1510_v27 }
 0x707   :  { %v1478_v15 = vadd.f32 %v1771_v31, %v1477_v19  ;;  %v1504_v41 = vmax.f32 %v1486_v14, 0.0 }
 0x709   :  { %v1502_v39 = vmax.f32 %v1478_v15, 0.0  ;;  %v1512_v16 = vpack.c.bf16 %v1504_v41, %v1503_v59 }
 0x70b   :  { %v1511_v23 = vpack.c.bf16 %v1502_v39, %v1501_v24 }
 0x70d   :  { %2025 = vmatprep.mubr.bf16.mxu1 %v1511_v23 }
 0x70e   :  { %2026 = vmatmul.mubr.bf16.gmra.mxu1 %v1512_v16 }
 0x7b6   :  { %v2015_v26 = vpop.f32.mrf.mxu0 }
 0x7b7   :  { %v1627_v29 = vadd.f32 %v2015_v26, %v1780_v22 }
 0x7b8   :  { %v1618_v62 = vpop.f32.mrf.mxu0 }
 0x7b9   :  { %1683 = vst [vmem:[%s2788_s12 + $0x10] sm:$0xff] %v1627_v29  ;;  %v1619_v2 = vadd.f32 %v1780_v22, %v1618_v62 }
 0x7ba   :  { %v2016_v58 = vpop.f32.mrf.mxu0 }
 0x7bb   :  { %1681 = vst [vmem:[%s2788_s12] sm:$0xff] %v1619_v2  ;;  %v1630_v43 = vadd.f32 %v2016_v58, %v1780_v22 }
 0x7bc   :  { %v1621_v18 = vpop.f32.mrf.mxu0 }
 0x7bd   :  { %1684 = vst [vmem:[%s2788_s12 + $0x18] sm:$0xff] %v1630_v43  ;;  %v1622_v47 = vadd.f32 %v1780_v22, %v1621_v18 }
 0x7be   :  { %v2019_v31 = vpop.f32.mrf.mxu0 }
 0x7bf   :  { %1682 = vst [vmem:[%s2788_s12 + $0x8] sm:$0xff] %v1622_v47  ;;  %v1643_v28 = vadd.f32 %v2019_v31, %v1780_v22 }
 0x7c0   :  { %v1634_v63 = vpop.f32.mrf.mxu0 }
 0x7c1   :  { %1687 = vst [vmem:[%s2788_s12 + $0x30] sm:$0xff] %v1643_v28  ;;  %v1635_v45 = vadd.f32 %v1780_v22, %v1634_v63 }
 0x7c2   :  { %v2020_v36 = vpop.f32.mrf.mxu0 }
 0x7c3   :  { %1685 = vst [vmem:[%s2788_s12 + $0x20] sm:$0xff] %v1635_v45  ;;  %v1646_v32 = vadd.f32 %v2020_v36, %v1780_v22 }
 0x7c4   :  { %v1637_v38 = vpop.f32.mrf.mxu0 }
 0x7c5   :  { %1688 = vst [vmem:[%s2788_s12 + $0x38] sm:$0xff] %v1646_v32  ;;  %v1638_v40 = vadd.f32 %v1780_v22, %v1637_v38 }
 0x7c6   :  { %v2023_v51 = vpop.f32.mrf.mxu1 }
 0x7c7   :  { %1686 = vst [vmem:[%s2788_s12 + $0x28] sm:$0xff] %v1638_v40  ;;  %v1659_v8 = vadd.f32 %v2023_v51, %v1780_v22 }
 0x7c8   :  { %v1650_v34 = vpop.f32.mrf.mxu1 }
 0x7c9   :  { %1691 = vst [vmem:[%s2788_s12 + $0x50] sm:$0xff] %v1659_v8  ;;  %v1651_v49 = vadd.f32 %v1780_v22, %v1650_v34 }
 0x7ca   :  { %v2024_v48 = vpop.f32.mrf.mxu1 }
 0x7cb   :  { %1689 = vst [vmem:[%s2788_s12 + $0x40] sm:$0xff] %v1651_v49  ;;  %v1662_v50 = vadd.f32 %v2024_v48, %v1780_v22 }
 0x7cc   :  { %v1653_v54 = vpop.f32.mrf.mxu1 }
 0x7cd   :  { %1692 = vst [vmem:[%s2788_s12 + $0x58] sm:$0xff] %v1662_v50  ;;  %v1654_v56 = vadd.f32 %v1780_v22, %v1653_v54 }
 0x7ce   :  { %v2027_v0 = vpop.f32.mrf.mxu1 }
 0x7cf   :  { %1690 = vst [vmem:[%s2788_s12 + $0x48] sm:$0xff] %v1654_v56  ;;  %v1675_v44 = vadd.f32 %v2027_v0, %v1780_v22 }
 0x7d0   :  { %v1666_v55 = vpop.f32.mrf.mxu1 }
 0x7d1   :  { %1695 = vst [vmem:[%s2788_s12 + $0x70] sm:$0xff] %v1675_v44  ;;  %v1667_v46 = vadd.f32 %v1780_v22, %v1666_v55 }
 0x7d2   :  { %v2028_v53 = vpop.f32.mrf.mxu1 }
 0x7d3   :  { %1693 = vst [vmem:[%s2788_s12 + $0x60] sm:$0xff] %v1667_v46  ;;  %v1678_v30 = vadd.f32 %v2028_v53, %v1780_v22 }
 0x7d4   :  { %v1669_v35 = vpop.f32.mrf.mxu1 }
 0x7d5   :  { %1696 = vst [vmem:[%s2788_s12 + $0x78] sm:$0xff] %v1678_v30  ;;  %v1670_v17 = vadd.f32 %v1780_v22, %v1669_v35 }
 0x7d7   :  { %1694 = vst [vmem:[%s2788_s12 + $0x68] sm:$0xff] %v1670_v17 }
 0x7d8   :  { %1701 = vsyncpa [#allocation3], 1 }
 0x7d9   :  { %1702 = vsyncpa [#allocation5], 1 }
 0x7da   :  { %1703 = vsyncpa [#allocation8], 1 }

</bundles_post_ra>
